<compile_context>
chip_gen: v7x
topology: tpu7x:2x2x1
jax: 0.10.0
libtpu: 0.0.40
codegen_flags: <defaults>
</compile_context>

<pallas_src>
import jax
import jax.numpy as jnp
from jax.scipy.special import erf as _erf_exact
from jax.experimental import pallas as pl
from jax.experimental.pallas import tpu as pltpu

_SQRT_HALF = 0.7071067811865476
_LN_EPS = 1e-5


def _erf_poly(z):
    """Abramowitz & Stegun 7.1.26 erf approximation (|err| < 1.5e-7).

    Uses only exp/abs/reciprocal/mul/add/select so it lowers cleanly in Mosaic
    while matching PyTorch's exact (erf-based) nn.GELU to below f32 noise.
    """
    a1, a2, a3, a4, a5 = (0.254829592, -0.284496736, 1.421413741,
                          -1.453152027, 1.061405429)
    p = 0.3275911
    az = jnp.abs(z)
    # Exact reciprocal (EUP rcp path).  Switch approx=True once H*W/F scale and
    # the VALU slot becomes binding — at these toy shapes it is pure noise.
    t = pl.reciprocal(1.0 + p * az, approx=False)
    poly = ((((a5 * t + a4) * t + a3) * t + a2) * t + a1) * t
    mag = 1.0 - poly * jnp.exp(-az * az)
    return jnp.where(z < 0.0, -mag, mag)          # single select, no sign*mul


def _gelu_exact(x):
    return 0.5 * x * (1.0 + _erf_poly(x * _SQRT_HALF))


def _channel_layernorm(z, gamma, beta):
    """LayerNorm over the channel (sublane) axis at every position."""
    mu = jnp.mean(z, axis=0, keepdims=True)
    d = z - mu
    var = jnp.mean(d * d, axis=0, keepdims=True)
    return d * jax.lax.rsqrt(var + _LN_EPS) * gamma + beta


def _wlgc_kernel(x_ref, cls_ref, w_in_ref, b_in_ref, gamma_ref, beta_ref,
                 w_gi_ref, w_gc_ref, b_g_ref, w_out_ref, b_out_ref,
                 xo_ref, co_ref):
    """Bblk batch elements, fully fused in VMEM.

    x_ref      : (Bblk, F, HW)  channels x image positions (lane-dense)
    cls_ref    : (Bblk, F, 1)   cls position as a channel column
    w_in       : (hidden, F)    1x1 conv_in weight
    b_in       : (hidden, 1)
    gamma/beta : (C, 1)         LayerNorm affine over channels, C = hidden // 2
    w_gi       : (HW, F)        global_transform weight, image rows, transposed
    w_gc       : (1, F)         global_transform weight row for the cls slot
    b_g        : (1, F)
    w_out      : (F, C)         1x1 conv_out weight
    b_out      : (F, 1)
    xo_ref     : (Bblk, F, HW)
    co_ref     : (Bblk, F, 1)
    """
    C = gamma_ref.shape[0]
    bblk = x_ref.shape[0]

    # Hoist all parameter loads out of the per-batch loop.
    w_in = w_in_ref[...]
    b_in = b_in_ref[...]
    gamma = gamma_ref[...]
    beta = beta_ref[...]
    w_gi = w_gi_ref[...]
    w_gc = w_gc_ref[...]
    b_g = b_g_ref[...]
    w_out = w_out_ref[...]
    b_out = b_out_ref[...]

    for b in range(bblk):                       # small static unroll over the batch block
        x = x_ref[b]                            # (F, HW)
        cl = cls_ref[b]                         # (F, 1)

        # local_conv_in (1x1 conv == channel matmul) + bias + exact GELU.
        h_img = _gelu_exact(
            jnp.dot(w_in, x, preferred_element_type=jnp.float32) + b_in)      # (hidden, HW)
        h_cls = _gelu_exact(
            jnp.dot(w_in, cl, preferred_element_type=jnp.float32) + b_in)     # (hidden, 1)

        # torch.chunk(x_cls, 2, dim=1).  (Relayout-free only when C % 8 == 0;
        # here C = hidden//2 = F = 32.)
        z1_img, z2_img = h_img[:C, :], h_img[C:, :]
        z1_cls, z2_cls = h_cls[:C, :], h_cls[C:, :]

        # Channel LayerNorm (Transpose -> LayerNorm(C) -> Transpose in torch).
        z2n_img = _channel_layernorm(z2_img, gamma, beta)                     # (C, HW)
        z2n_cls = _channel_layernorm(z2_cls, gamma, beta)                     # (C, 1)

        # global_transform over the position axis: one lane-dense MXU matmul
        # for the HW image positions plus a rank-1 VPU update for the cls slot.
        z2g = (jnp.dot(z2n_img, w_gi, preferred_element_type=jnp.float32)
               + z2n_cls * w_gc + b_g)                                        # (C, F)

        # Reassociated tail: w_out @ (z2g @ z1) == (w_out @ z2g) @ z1, so the
        # (C, HW) mix intermediate never materializes and the wide matmul
        # runs only once.
        wz = jnp.dot(w_out, z2g, preferred_element_type=jnp.float32)          # (F, C)

        xo_ref[b] = (jnp.dot(wz, z1_img, preferred_element_type=jnp.float32)
                     + b_out).astype(xo_ref.dtype)
        co_ref[b] = (jnp.dot(wz, z1_cls, preferred_element_type=jnp.float32)
                     + b_out).astype(co_ref.dtype)


def _pick_batch_block(B, max_block=8):
    """Largest divisor of B (capped) that still leaves >= 2 grid steps, so the
    'parallel' batch axis keeps sharding across both v7x TensorCores."""
    if B < 2:
        return 1
    best = 1
    for cand in range(2, min(B // 2, max_block) + 1):
        if B % cand == 0:
            best = cand
    return best


def wlgc_forward(kparams, x, cls_token):
    """x: (B, F, H, W), cls_token: (B, F, 1, 1) -> (x_out, cls_out)."""
    (w_in, b_in_col, gamma_col, beta_col,
     w_gi, w_gc, b_g_row, w_out, b_out_col) = kparams
    B, F, H, W = x.shape
    HW = H * W

    # Free reshapes only: channel-major, image positions on lanes, cls kept as
    # its own 1-wide column input.  No concat / pad / slice copies in HBM.
    x_img = x.reshape(B, F, HW)
    cls_col = cls_token.reshape(B, F, 1)

    bblk = _pick_batch_block(B)
    grid = (B // bblk,)

    def _full(arr):
        return pl.BlockSpec(arr.shape, lambda i, _n=arr.ndim: (0,) * _n)

    # TODO(synk): for very large F*HW (e.g. F=512, 64x64 images) on v7x's 64 MiB
    # VMEM, add a K-blocked grid axis ("arbitrary") over HW for the global
    # transform instead of loading w_gi / the full x slab at once.
    out_img, out_cls = pl.pallas_call(
        _wlgc_kernel,
        out_shape=(jax.ShapeDtypeStruct((B, F, HW), x.dtype),
                   jax.ShapeDtypeStruct((B, F, 1), x.dtype)),
        grid_spec=pltpu.PrefetchScalarGridSpec(
            num_scalar_prefetch=0,
            grid=grid,
            in_specs=[
                pl.BlockSpec((bblk, F, HW), lambda i: (i, 0, 0)),
                pl.BlockSpec((bblk, F, 1), lambda i: (i, 0, 0)),
                _full(w_in), _full(b_in_col), _full(gamma_col), _full(beta_col),
                _full(w_gi), _full(w_gc), _full(b_g_row),
                _full(w_out), _full(b_out_col),
            ],
            out_specs=[
                pl.BlockSpec((bblk, F, HW), lambda i: (i, 0, 0)),
                pl.BlockSpec((bblk, F, 1), lambda i: (i, 0, 0)),
            ],
        ),
        compiler_params=pltpu.CompilerParams(
            dimension_semantics=("parallel",)),
    )(x_img, cls_col, w_in, b_in_col, gamma_col, beta_col,
      w_gi, w_gc, b_g_row, w_out, b_out_col)

    return out_img.reshape(B, F, H, W), out_cls.reshape(B, F, 1, 1)


_wlgc_forward_jit = jax.jit(wlgc_forward)


class WeightLocalGlobalConvolutionPallas:
    """JAX/Pallas port of the PyTorch WeightLocalGlobalConvolution forward."""
    # TODO(synk): kernel_size > 1 (true spatial convs) and the 'batch_norm'
    # branch (which raises in PyTorch itself: BatchNorm2d on the 3-D z2) are
    # not implemented; use_cls_token=False raises in the reference too.

    def __init__(self, input_shapes, hidden_features, kernel_size=1,
                 use_cls_token=True, normalization='layer_norm', *, key):
        assert kernel_size == 1, "only kernel_size=1 is implemented"
        assert use_cls_token, "use_cls_token=False raises in the reference too"
        assert normalization == 'layer_norm'
        features = input_shapes[0]
        assert hidden_features // 2 == features, (
            "the reference einsum requires hidden_features // 2 == features")
        self.features = features
        self.hidden_features = hidden_features
        self.kernel_size = kernel_size
        C = hidden_features // 2
        HW = input_shapes[-1] * input_shapes[-2]
        L = HW + kernel_size ** 2

        def _uniform(k, shape, fan_in):
            bound = 1.0 / (fan_in ** 0.5)
            return jax.random.uniform(k, shape, jnp.float32, -bound, bound)

        ks = jax.random.split(key, 6)
        # PyTorch-layout parameters (used by the pure-JAX reference).
        w_in = _uniform(ks[0], (hidden_features, features), features)    # Conv2d 1x1
        b_in = _uniform(ks[1], (hidden_features,), features)
        gamma = jnp.ones((C,), jnp.float32)                               # LayerNorm
        beta = jnp.zeros((C,), jnp.float32)
        w_g = _uniform(ks[2], (features, L), L)                           # Linear(L, F)
        b_g = _uniform(ks[3], (features,), L)
        w_out = _uniform(ks[4], (features, C), C)                         # Conv2d 1x1
        b_out = _uniform(ks[5], (features,), C)
        self.torch_params = (w_in, b_in, gamma, beta, w_g, b_g, w_out, b_out)

        # Kernel-layout params, folded once at init: the global weight is split
        # into a lane-dense image block (transposed) and the single cls row, so
        # the kernel never pads / concats at runtime.
        self.params = (w_in, b_in[:, None], gamma[:, None], beta[:, None],
                       jnp.transpose(w_g[:, :HW]),            # (HW, F)
                       jnp.transpose(w_g[:, HW:]),            # (1, F)  (k == 1)
                       b_g[None, :], w_out, b_out[:, None])

    def __call__(self, x, cls_token):
        return _wlgc_forward_jit(self.params, x, cls_token)


def reference_forward(torch_params, x, cls_token, eps=_LN_EPS):
    """Pure-JAX mirror of the PyTorch forward (layer_norm branch, k=1)."""
    w_in, b_in, gamma, beta, w_g, b_g, w_out, b_out = torch_params
    hi = jax.lax.Precision.HIGHEST
    B, F, H, W = x.shape
    gelu = lambda t: 0.5 * t * (1.0 + _erf_exact(t * _SQRT_HALF))
    conv1x1 = lambda w, b, t: (jnp.einsum('oi,bihw->bohw', w, t, precision=hi)
                               + b[None, :, None, None])
    hx = gelu(conv1x1(w_in, b_in, x))
    hc = gelu(conv1x1(w_in, b_in, cls_token))
    x_cls = jnp.concatenate([hx.reshape(B, hx.shape[1], -1),
                             hc.reshape(B, hc.shape[1], -1)], axis=-1)
    C = x_cls.shape[1] // 2
    z1, z2 = x_cls[:, :C], x_cls[:, C:]
    mu = z2.mean(axis=1, keepdims=True)
    var = ((z2 - mu) ** 2).mean(axis=1, keepdims=True)
    z2 = ((z2 - mu) / jnp.sqrt(var + eps)
          * gamma[None, :, None] + beta[None, :, None])
    z2 = jnp.einsum('bcl,fl->bcf', z2, w_g, precision=hi) + b_g[None, None, :]
    mix = jnp.einsum('bij,bjf->bif', z2, z1, precision=hi)
    xo = mix[..., :-1].reshape(B, C, H, W)
    co = mix[..., -1:].reshape(B, C, 1, 1)
    return conv1x1(w_out, b_out, xo), conv1x1(w_out, b_out, co)


if __name__ == "__main__":
    key = jax.random.PRNGKey(0)
    kx, kc, kp = jax.random.split(key, 3)

    B, F, H, W = 2, 32, 16, 16            # input_shapes = (F, H, W)
    hidden_features = 64                  # hidden // 2 == F, as the forward requires

    x = jax.random.normal(kx, (B, F, H, W), jnp.float32)
    cls_token = jax.random.normal(kc, (B, F, 1, 1), jnp.float32)

    model = WeightLocalGlobalConvolutionPallas((F, H, W), hidden_features, key=kp)

    x_out, cls_out = model(x, cls_token)
    x_out, cls_out = jax.block_until_ready((x_out, cls_out))

    rx, rc = reference_forward(model.torch_params, x, cls_token)
    assert x_out.shape == (B, F, H, W)
    assert cls_out.shape == (B, F, 1, 1)
    assert jnp.allclose(x_out, rx, atol=2e-3, rtol=2e-3), \
        float(jnp.abs(x_out - rx).max())
    assert jnp.allclose(cls_out, rc, atol=2e-3, rtol=2e-3), \
        float(jnp.abs(cls_out - rc).max())

    print("KERNEL_OK")
</pallas_src>

<mosaic_0001>
module attributes {stable_mosaic.version = 11 : i64} {
  func.func @_wlgc_kernel(%arg0: i32, %arg1: memref<1x32x256xf32, #tpu.memory_space<vmem>>, %arg2: memref<1x32x1xf32, #tpu.memory_space<vmem>>, %arg3: memref<64x32xf32, #tpu.memory_space<vmem>>, %arg4: memref<64x1xf32, #tpu.memory_space<vmem>>, %arg5: memref<32x1xf32, #tpu.memory_space<vmem>>, %arg6: memref<32x1xf32, #tpu.memory_space<vmem>>, %arg7: memref<256x32xf32, #tpu.memory_space<vmem>>, %arg8: memref<1x32xf32, #tpu.memory_space<vmem>>, %arg9: memref<1x32xf32, #tpu.memory_space<vmem>>, %arg10: memref<32x32xf32, #tpu.memory_space<vmem>>, %arg11: memref<32x1xf32, #tpu.memory_space<vmem>>, %arg12: memref<1x32x256xf32, #tpu.memory_space<vmem>>, %arg13: memref<1x32x1xf32, #tpu.memory_space<vmem>>) attributes {dimension_semantics = [#tpu.dimension_semantics<parallel>], iteration_bounds = array<i64: 2>, scalar_prefetch = 0 : i64, scratch_operands = 0 : i64, tpu.core_type = #tpu.core_type<tc>, window_params = [{transform_indices = @transform_0, window_bounds = array<i64: 1, 32, 256>}, {transform_indices = @transform_1, window_bounds = array<i64: 1, 32, 1>}, {pipeline_mode = #tpu.pipeline_mode<synchronous>, transform_indices = @transform_2, window_bounds = array<i64: 64, 32>}, {pipeline_mode = #tpu.pipeline_mode<synchronous>, transform_indices = @transform_3, window_bounds = array<i64: 64, 1>}, {pipeline_mode = #tpu.pipeline_mode<synchronous>, transform_indices = @transform_4, window_bounds = array<i64: 32, 1>}, {pipeline_mode = #tpu.pipeline_mode<synchronous>, transform_indices = @transform_5, window_bounds = array<i64: 32, 1>}, {pipeline_mode = #tpu.pipeline_mode<synchronous>, transform_indices = @transform_6, window_bounds = array<i64: 256, 32>}, {pipeline_mode = #tpu.pipeline_mode<synchronous>, transform_indices = @transform_7, window_bounds = array<i64: 1, 32>}, {pipeline_mode = #tpu.pipeline_mode<synchronous>, transform_indices = @transform_8, window_bounds = array<i64: 1, 32>}, {pipeline_mode = #tpu.pipeline_mode<synchronous>, transform_indices = @transform_9, window_bounds = array<i64: 32, 32>}, {pipeline_mode = #tpu.pipeline_mode<synchronous>, transform_indices = @transform_10, window_bounds = array<i64: 32, 1>}, {transform_indices = @transform_11, window_bounds = array<i64: 1, 32, 256>}, {transform_indices = @transform_12, window_bounds = array<i64: 1, 32, 1>}]} {
    %c0 = arith.constant 0 : index
    %c0_0 = arith.constant 0 : index
    %0 = vector.load %arg3[%c0, %c0_0] : memref<64x32xf32, #tpu.memory_space<vmem>>, vector<64x32xf32>
    %c0_1 = arith.constant 0 : index
    %c0_2 = arith.constant 0 : index
    %1 = vector.load %arg4[%c0_1, %c0_2] : memref<64x1xf32, #tpu.memory_space<vmem>>, vector<64x1xf32>
    %c0_3 = arith.constant 0 : index
    %c0_4 = arith.constant 0 : index
    %2 = vector.load %arg5[%c0_3, %c0_4] : memref<32x1xf32, #tpu.memory_space<vmem>>, vector<32x1xf32>
    %c0_5 = arith.constant 0 : index
    %c0_6 = arith.constant 0 : index
    %3 = vector.load %arg6[%c0_5, %c0_6] : memref<32x1xf32, #tpu.memory_space<vmem>>, vector<32x1xf32>
    %c0_7 = arith.constant 0 : index
    %c0_8 = arith.constant 0 : index
    %4 = vector.load %arg7[%c0_7, %c0_8] : memref<256x32xf32, #tpu.memory_space<vmem>>, vector<256x32xf32>
    %c0_9 = arith.constant 0 : index
    %c0_10 = arith.constant 0 : index
    %5 = vector.load %arg8[%c0_9, %c0_10] : memref<1x32xf32, #tpu.memory_space<vmem>>, vector<1x32xf32>
    %c0_11 = arith.constant 0 : index
    %c0_12 = arith.constant 0 : index
    %6 = vector.load %arg9[%c0_11, %c0_12] : memref<1x32xf32, #tpu.memory_space<vmem>>, vector<1x32xf32>
    %c0_13 = arith.constant 0 : index
    %c0_14 = arith.constant 0 : index
    %7 = vector.load %arg10[%c0_13, %c0_14] : memref<32x32xf32, #tpu.memory_space<vmem>>, vector<32x32xf32>
    %c0_15 = arith.constant 0 : index
    %c0_16 = arith.constant 0 : index
    %8 = vector.load %arg11[%c0_15, %c0_16] : memref<32x1xf32, #tpu.memory_space<vmem>>, vector<32x1xf32>
    %c0_17 = arith.constant 0 : index
    %c0_18 = arith.constant 0 : index
    %c0_19 = arith.constant 0 : index
    %9 = vector.load %arg1[%c0_17, %c0_18, %c0_19] : memref<1x32x256xf32, #tpu.memory_space<vmem>>, vector<1x32x256xf32>
    %10 = vector.shape_cast %9 : vector<1x32x256xf32> to vector<32x256xf32>
    %c0_20 = arith.constant 0 : index
    %c0_21 = arith.constant 0 : index
    %c0_22 = arith.constant 0 : index
    %11 = vector.load %arg2[%c0_20, %c0_21, %c0_22] : memref<1x32x1xf32, #tpu.memory_space<vmem>>, vector<1x32x1xf32>
    %12 = vector.shape_cast %11 : vector<1x32x1xf32> to vector<32x1xf32>
    %cst = arith.constant dense<0.000000e+00> : vector<64x256xf32>
    %13 = tpu.matmul %0, %10, %cst {dimension_numbers = #tpu.dot_dimension_numbers<[1], [0], [0], [1], [0, 0, 1, 1], [], []>} : vector<64x32xf32>, vector<32x256xf32>, vector<64x256xf32> -> vector<64x256xf32>
    %14 = vector.broadcast %1 : vector<64x1xf32> to vector<64x256xf32>
    %15 = arith.addf %13, %14 : vector<64x256xf32>
    %cst_23 = arith.constant 5.000000e-01 : f32
    %16 = vector.broadcast %cst_23 : f32 to vector<64x256xf32>
    %17 = arith.mulf %16, %15 : vector<64x256xf32>
    %cst_24 = arith.constant 0.707106769 : f32
    %18 = vector.broadcast %cst_24 : f32 to vector<64x256xf32>
    %19 = arith.mulf %15, %18 : vector<64x256xf32>
    %20 = math.absf %19 : vector<64x256xf32>
    %cst_25 = arith.constant 0.327591091 : f32
    %21 = vector.broadcast %cst_25 : f32 to vector<64x256xf32>
    %22 = arith.mulf %21, %20 : vector<64x256xf32>
    %cst_26 = arith.constant 1.000000e+00 : f32
    %23 = vector.broadcast %cst_26 : f32 to vector<64x256xf32>
    %24 = arith.addf %23, %22 : vector<64x256xf32>
    %25 = tpu.reciprocal %24 : vector<64x256xf32> -> vector<64x256xf32>
    %cst_27 = arith.constant 1.06140542 : f32
    %26 = vector.broadcast %cst_27 : f32 to vector<64x256xf32>
    %27 = arith.mulf %26, %25 : vector<64x256xf32>
    %cst_28 = arith.constant -1.45315206 : f32
    %28 = vector.broadcast %cst_28 : f32 to vector<64x256xf32>
    %29 = arith.addf %27, %28 : vector<64x256xf32>
    %30 = arith.mulf %29, %25 : vector<64x256xf32>
    %cst_29 = arith.constant 1.42141378 : f32
    %31 = vector.broadcast %cst_29 : f32 to vector<64x256xf32>
    %32 = arith.addf %30, %31 : vector<64x256xf32>
    %33 = arith.mulf %32, %25 : vector<64x256xf32>
    %cst_30 = arith.constant -0.284496725 : f32
    %34 = vector.broadcast %cst_30 : f32 to vector<64x256xf32>
    %35 = arith.addf %33, %34 : vector<64x256xf32>
    %36 = arith.mulf %35, %25 : vector<64x256xf32>
    %cst_31 = arith.constant 0.254829586 : f32
    %37 = vector.broadcast %cst_31 : f32 to vector<64x256xf32>
    %38 = arith.addf %36, %37 : vector<64x256xf32>
    %39 = arith.mulf %38, %25 : vector<64x256xf32>
    %cst_32 = arith.constant 0.000000e+00 : f32
    %40 = vector.broadcast %cst_32 : f32 to vector<64x256xf32>
    %41 = arith.subf %40, %20 : vector<64x256xf32>
    %42 = arith.mulf %41, %20 : vector<64x256xf32>
    %43 = math.exp %42 : vector<64x256xf32>
    %44 = arith.mulf %39, %43 : vector<64x256xf32>
    %cst_33 = arith.constant 1.000000e+00 : f32
    %45 = vector.broadcast %cst_33 : f32 to vector<64x256xf32>
    %46 = arith.subf %45, %44 : vector<64x256xf32>
    %cst_34 = arith.constant 0.000000e+00 : f32
    %47 = vector.broadcast %cst_34 : f32 to vector<64x256xf32>
    %48 = arith.cmpf olt, %19, %47 : vector<64x256xf32>
    %cst_35 = arith.constant 0.000000e+00 : f32
    %49 = vector.broadcast %cst_35 : f32 to vector<64x256xf32>
    %50 = arith.subf %49, %46 : vector<64x256xf32>
    %51 = arith.select %48, %50, %46 : vector<64x256xi1>, vector<64x256xf32>
    %cst_36 = arith.constant 1.000000e+00 : f32
    %52 = vector.broadcast %cst_36 : f32 to vector<64x256xf32>
    %53 = arith.addf %52, %51 : vector<64x256xf32>
    %54 = arith.mulf %17, %53 : vector<64x256xf32>
    %cst_37 = arith.constant dense<0.000000e+00> : vector<64x1xf32>
    %55 = tpu.matmul %0, %12, %cst_37 {dimension_numbers = #tpu.dot_dimension_numbers<[1], [0], [0], [1], [0, 0, 1, 1], [], []>} : vector<64x32xf32>, vector<32x1xf32>, vector<64x1xf32> -> vector<64x1xf32>
    %56 = arith.addf %55, %1 : vector<64x1xf32>
    %cst_38 = arith.constant 5.000000e-01 : f32
    %57 = vector.broadcast %cst_38 : f32 to vector<64x1xf32>
    %58 = arith.mulf %57, %56 : vector<64x1xf32>
    %cst_39 = arith.constant 0.707106769 : f32
    %59 = vector.broadcast %cst_39 : f32 to vector<64x1xf32>
    %60 = arith.mulf %56, %59 : vector<64x1xf32>
    %61 = math.absf %60 : vector<64x1xf32>
    %cst_40 = arith.constant 0.327591091 : f32
    %62 = vector.broadcast %cst_40 : f32 to vector<64x1xf32>
    %63 = arith.mulf %62, %61 : vector<64x1xf32>
    %cst_41 = arith.constant 1.000000e+00 : f32
    %64 = vector.broadcast %cst_41 : f32 to vector<64x1xf32>
    %65 = arith.addf %64, %63 : vector<64x1xf32>
    %66 = tpu.reciprocal %65 : vector<64x1xf32> -> vector<64x1xf32>
    %cst_42 = arith.constant 1.06140542 : f32
    %67 = vector.broadcast %cst_42 : f32 to vector<64x1xf32>
    %68 = arith.mulf %67, %66 : vector<64x1xf32>
    %cst_43 = arith.constant -1.45315206 : f32
    %69 = vector.broadcast %cst_43 : f32 to vector<64x1xf32>
    %70 = arith.addf %68, %69 : vector<64x1xf32>
    %71 = arith.mulf %70, %66 : vector<64x1xf32>
    %cst_44 = arith.constant 1.42141378 : f32
    %72 = vector.broadcast %cst_44 : f32 to vector<64x1xf32>
    %73 = arith.addf %71, %72 : vector<64x1xf32>
    %74 = arith.mulf %73, %66 : vector<64x1xf32>
    %cst_45 = arith.constant -0.284496725 : f32
    %75 = vector.broadcast %cst_45 : f32 to vector<64x1xf32>
    %76 = arith.addf %74, %75 : vector<64x1xf32>
    %77 = arith.mulf %76, %66 : vector<64x1xf32>
    %cst_46 = arith.constant 0.254829586 : f32
    %78 = vector.broadcast %cst_46 : f32 to vector<64x1xf32>
    %79 = arith.addf %77, %78 : vector<64x1xf32>
    %80 = arith.mulf %79, %66 : vector<64x1xf32>
    %cst_47 = arith.constant 0.000000e+00 : f32
    %81 = vector.broadcast %cst_47 : f32 to vector<64x1xf32>
    %82 = arith.subf %81, %61 : vector<64x1xf32>
    %83 = arith.mulf %82, %61 : vector<64x1xf32>
    %84 = math.exp %83 : vector<64x1xf32>
    %85 = arith.mulf %80, %84 : vector<64x1xf32>
    %cst_48 = arith.constant 1.000000e+00 : f32
    %86 = vector.broadcast %cst_48 : f32 to vector<64x1xf32>
    %87 = arith.subf %86, %85 : vector<64x1xf32>
    %cst_49 = arith.constant 0.000000e+00 : f32
    %88 = vector.broadcast %cst_49 : f32 to vector<64x1xf32>
    %89 = arith.cmpf olt, %60, %88 : vector<64x1xf32>
    %cst_50 = arith.constant 0.000000e+00 : f32
    %90 = vector.broadcast %cst_50 : f32 to vector<64x1xf32>
    %91 = arith.subf %90, %87 : vector<64x1xf32>
    %92 = arith.select %89, %91, %87 : vector<64x1xi1>, vector<64x1xf32>
    %cst_51 = arith.constant 1.000000e+00 : f32
    %93 = vector.broadcast %cst_51 : f32 to vector<64x1xf32>
    %94 = arith.addf %93, %92 : vector<64x1xf32>
    %95 = arith.mulf %58, %94 : vector<64x1xf32>
    %96 = vector.extract_strided_slice %54 {offsets = [0, 0], sizes = [32, 256], strides = [1, 1]} : vector<64x256xf32> to vector<32x256xf32>
    %97 = vector.extract_strided_slice %54 {offsets = [32, 0], sizes = [32, 256], strides = [1, 1]} : vector<64x256xf32> to vector<32x256xf32>
    %98 = vector.extract_strided_slice %95 {offsets = [0, 0], sizes = [32, 1], strides = [1, 1]} : vector<64x1xf32> to vector<32x1xf32>
    %99 = vector.extract_strided_slice %95 {offsets = [32, 0], sizes = [32, 1], strides = [1, 1]} : vector<64x1xf32> to vector<32x1xf32>
    %cst_52 = arith.constant dense<0.000000e+00> : vector<256xf32>
    %100 = vector.multi_reduction <add>, %97, %cst_52 [0] : vector<32x256xf32> to vector<256xf32>
    %101 = vector.shape_cast %100 : vector<256xf32> to vector<1x256xf32>
    %cst_53 = arith.constant 3.200000e+01 : f32
    %102 = vector.broadcast %cst_53 : f32 to vector<1x256xf32>
    %103 = arith.divf %101, %102 : vector<1x256xf32>
    %104 = vector.broadcast %103 : vector<1x256xf32> to vector<32x256xf32>
    %105 = arith.subf %97, %104 : vector<32x256xf32>
    %106 = arith.mulf %105, %105 : vector<32x256xf32>
    %cst_54 = arith.constant dense<0.000000e+00> : vector<256xf32>
    %107 = vector.multi_reduction <add>, %106, %cst_54 [0] : vector<32x256xf32> to vector<256xf32>
    %108 = vector.shape_cast %107 : vector<256xf32> to vector<1x256xf32>
    %cst_55 = arith.constant 3.200000e+01 : f32
    %109 = vector.broadcast %cst_55 : f32 to vector<1x256xf32>
    %110 = arith.divf %108, %109 : vector<1x256xf32>
    %cst_56 = arith.constant 9.99999974E-6 : f32
    %111 = vector.broadcast %cst_56 : f32 to vector<1x256xf32>
    %112 = arith.addf %110, %111 : vector<1x256xf32>
    %113 = math.rsqrt %112 : vector<1x256xf32>
    %114 = vector.broadcast %113 : vector<1x256xf32> to vector<32x256xf32>
    %115 = arith.mulf %105, %114 : vector<32x256xf32>
    %116 = vector.broadcast %2 : vector<32x1xf32> to vector<32x256xf32>
    %117 = arith.mulf %115, %116 : vector<32x256xf32>
    %118 = vector.broadcast %3 : vector<32x1xf32> to vector<32x256xf32>
    %119 = arith.addf %117, %118 : vector<32x256xf32>
    %cst_57 = arith.constant dense<0.000000e+00> : vector<1xf32>
    %120 = vector.multi_reduction <add>, %99, %cst_57 [0] : vector<32x1xf32> to vector<1xf32>
    %121 = vector.shape_cast %120 : vector<1xf32> to vector<1x1xf32>
    %cst_58 = arith.constant 3.200000e+01 : f32
    %122 = vector.broadcast %cst_58 : f32 to vector<1x1xf32>
    %123 = arith.divf %121, %122 : vector<1x1xf32>
    %124 = vector.broadcast %123 : vector<1x1xf32> to vector<32x1xf32>
    %125 = arith.subf %99, %124 : vector<32x1xf32>
    %126 = arith.mulf %125, %125 : vector<32x1xf32>
    %cst_59 = arith.constant dense<0.000000e+00> : vector<1xf32>
    %127 = vector.multi_reduction <add>, %126, %cst_59 [0] : vector<32x1xf32> to vector<1xf32>
    %128 = vector.shape_cast %127 : vector<1xf32> to vector<1x1xf32>
    %cst_60 = arith.constant 3.200000e+01 : f32
    %129 = vector.broadcast %cst_60 : f32 to vector<1x1xf32>
    %130 = arith.divf %128, %129 : vector<1x1xf32>
    %cst_61 = arith.constant 9.99999974E-6 : f32
    %131 = vector.broadcast %cst_61 : f32 to vector<1x1xf32>
    %132 = arith.addf %130, %131 : vector<1x1xf32>
    %133 = math.rsqrt %132 : vector<1x1xf32>
    %134 = vector.broadcast %133 : vector<1x1xf32> to vector<32x1xf32>
    %135 = arith.mulf %125, %134 : vector<32x1xf32>
    %136 = arith.mulf %135, %2 : vector<32x1xf32>
    %137 = arith.addf %136, %3 : vector<32x1xf32>
    %cst_62 = arith.constant dense<0.000000e+00> : vector<32x32xf32>
    %138 = tpu.matmul %119, %4, %cst_62 {dimension_numbers = #tpu.dot_dimension_numbers<[1], [0], [0], [1], [0, 0, 1, 1], [], []>} : vector<32x256xf32>, vector<256x32xf32>, vector<32x32xf32> -> vector<32x32xf32>
    %139 = vector.broadcast %137 : vector<32x1xf32> to vector<32x32xf32>
    %140 = vector.broadcast %5 : vector<1x32xf32> to vector<32x32xf32>
    %141 = arith.mulf %139, %140 : vector<32x32xf32>
    %142 = arith.addf %138, %141 : vector<32x32xf32>
    %143 = vector.broadcast %6 : vector<1x32xf32> to vector<32x32xf32>
    %144 = arith.addf %142, %143 : vector<32x32xf32>
    %cst_63 = arith.constant dense<0.000000e+00> : vector<32x32xf32>
    %145 = tpu.matmul %7, %144, %cst_63 {dimension_numbers = #tpu.dot_dimension_numbers<[1], [0], [0], [1], [0, 0, 1, 1], [], []>} : vector<32x32xf32>, vector<32x32xf32>, vector<32x32xf32> -> vector<32x32xf32>
    %cst_64 = arith.constant dense<0.000000e+00> : vector<32x256xf32>
    %146 = tpu.matmul %145, %96, %cst_64 {dimension_numbers = #tpu.dot_dimension_numbers<[1], [0], [0], [1], [0, 0, 1, 1], [], []>} : vector<32x32xf32>, vector<32x256xf32>, vector<32x256xf32> -> vector<32x256xf32>
    %147 = vector.broadcast %8 : vector<32x1xf32> to vector<32x256xf32>
    %148 = arith.addf %146, %147 : vector<32x256xf32>
    %c0_65 = arith.constant 0 : index
    %c0_66 = arith.constant 0 : index
    %c0_67 = arith.constant 0 : index
    %149 = vector.load %arg12[%c0_65, %c0_66, %c0_67] : memref<1x32x256xf32, #tpu.memory_space<vmem>>, vector<1x32x256xf32>
    %150 = vector.shape_cast %149 : vector<1x32x256xf32> to vector<32x256xf32>
    %151 = vector.shape_cast %148 : vector<32x256xf32> to vector<1x32x256xf32>
    tpu.vector_store %arg12[%c0_65, %c0_66, %c0_67], %151 {strides = array<i32>} : memref<1x32x256xf32, #tpu.memory_space<vmem>>, vector<1x32x256xf32>,
    %cst_68 = arith.constant dense<0.000000e+00> : vector<32x1xf32>
    %152 = tpu.matmul %145, %98, %cst_68 {dimension_numbers = #tpu.dot_dimension_numbers<[1], [0], [0], [1], [0, 0, 1, 1], [], []>} : vector<32x32xf32>, vector<32x1xf32>, vector<32x1xf32> -> vector<32x1xf32>
    %153 = arith.addf %152, %8 : vector<32x1xf32>
    %c0_69 = arith.constant 0 : index
    %c0_70 = arith.constant 0 : index
    %c0_71 = arith.constant 0 : index
    %154 = vector.load %arg13[%c0_69, %c0_70, %c0_71] : memref<1x32x1xf32, #tpu.memory_space<vmem>>, vector<1x32x1xf32>
    %155 = vector.shape_cast %154 : vector<1x32x1xf32> to vector<32x1xf32>
    %156 = vector.shape_cast %153 : vector<32x1xf32> to vector<1x32x1xf32>
    tpu.vector_store %arg13[%c0_69, %c0_70, %c0_71], %156 {strides = array<i32>} : memref<1x32x1xf32, #tpu.memory_space<vmem>>, vector<1x32x1xf32>,
    return
  }
  func.func @transform_0(%arg0: i32) -> (i32, i32, i32) {
    %c0_i32 = arith.constant 0 : i32
    %c0_i32_0 = arith.constant 0 : i32
    %c0_i32_1 = arith.constant 0 : i32
    return %arg0, %c0_i32, %c0_i32_0 : i32, i32, i32
  }
  func.func @transform_1(%arg0: i32) -> (i32, i32, i32) {
    %c0_i32 = arith.constant 0 : i32
    %c0_i32_0 = arith.constant 0 : i32
    %c0_i32_1 = arith.constant 0 : i32
    return %arg0, %c0_i32, %c0_i32_0 : i32, i32, i32
  }
  func.func @transform_2(%arg0: i32) -> (i32, i32) {
    %c0_i32 = arith.constant 0 : i32
    %c0_i32_0 = arith.constant 0 : i32
    %c0_i32_1 = arith.constant 0 : i32
    return %c0_i32, %c0_i32_0 : i32, i32
  }
  func.func @transform_3(%arg0: i32) -> (i32, i32) {
    %c0_i32 = arith.constant 0 : i32
    %c0_i32_0 = arith.constant 0 : i32
    %c0_i32_1 = arith.constant 0 : i32
    return %c0_i32, %c0_i32_0 : i32, i32
  }
  func.func @transform_4(%arg0: i32) -> (i32, i32) {
    %c0_i32 = arith.constant 0 : i32
    %c0_i32_0 = arith.constant 0 : i32
    %c0_i32_1 = arith.constant 0 : i32
    return %c0_i32, %c0_i32_0 : i32, i32
  }
  func.func @transform_5(%arg0: i32) -> (i32, i32) {
    %c0_i32 = arith.constant 0 : i32
    %c0_i32_0 = arith.constant 0 : i32
    %c0_i32_1 = arith.constant 0 : i32
    return %c0_i32, %c0_i32_0 : i32, i32
  }
  func.func @transform_6(%arg0: i32) -> (i32, i32) {
    %c0_i32 = arith.constant 0 : i32
    %c0_i32_0 = arith.constant 0 : i32
    %c0_i32_1 = arith.constant 0 : i32
    return %c0_i32, %c0_i32_0 : i32, i32
  }
  func.func @transform_7(%arg0: i32) -> (i32, i32) {
    %c0_i32 = arith.constant 0 : i32
    %c0_i32_0 = arith.constant 0 : i32
    %c0_i32_1 = arith.constant 0 : i32
    return %c0_i32, %c0_i32_0 : i32, i32
  }
  func.func @transform_8(%arg0: i32) -> (i32, i32) {
    %c0_i32 = arith.constant 0 : i32
    %c0_i32_0 = arith.constant 0 : i32
    %c0_i32_1 = arith.constant 0 : i32
    return %c0_i32, %c0_i32_0 : i32, i32
  }
  func.func @transform_9(%arg0: i32) -> (i32, i32) {
    %c0_i32 = arith.constant 0 : i32
    %c0_i32_0 = arith.constant 0 : i32
    %c0_i32_1 = arith.constant 0 : i32
    return %c0_i32, %c0_i32_0 : i32, i32
  }
  func.func @transform_10(%arg0: i32) -> (i32, i32) {
    %c0_i32 = arith.constant 0 : i32
    %c0_i32_0 = arith.constant 0 : i32
    %c0_i32_1 = arith.constant 0 : i32
    return %c0_i32, %c0_i32_0 : i32, i32
  }
  func.func @transform_11(%arg0: i32) -> (i32, i32, i32) {
    %c0_i32 = arith.constant 0 : i32
    %c0_i32_0 = arith.constant 0 : i32
    %c0_i32_1 = arith.constant 0 : i32
    return %arg0, %c0_i32, %c0_i32_0 : i32, i32, i32
  }
  func.func @transform_12(%arg0: i32) -> (i32, i32, i32) {
    %c0_i32 = arith.constant 0 : i32
    %c0_i32_0 = arith.constant 0 : i32
    %c0_i32_1 = arith.constant 0 : i32
    return %arg0, %c0_i32, %c0_i32_0 : i32, i32, i32
  }
}

</mosaic_0001>

<bundles_post_ra>
// kernel: wlgc_forward.1
= control target key start
LH: loop header
LB: loop body
LE: loop exit
PB: predicated region body
PF: predicated region fallthrough
CT: control target
= control target key end

     0   :  { %s2590_s21 = smov 0   ;;  %s3565_s0 = inlined_call_operand.vmem [shape: f32[2,32,256], index: 0, kind: input, shape index: {}]   ;;  %s3566_s1 = inlined_call_operand.vmem [shape: f32[2,32,1], index: 1, kind: input, shape index: {}]   ;;  %s3567_s2 = inlined_call_operand.vmem [shape: f32[64,32], index: 2, kind: input, shape index: {}]   ;;  %s3568_s3 = inlined_call_operand.vmem [shape: f32[64,1], index: 3, kind: input, shape index: {}]   ;;  %s3569_s4 = inlined_call_operand.vmem [shape: f32[32,1], index: 4, kind: input, shape index: {}]   ;;  %s3570_s5 = inlined_call_operand.vmem [shape: f32[32,1], index: 5, kind: input, shape index: {}]   ;;  %s3571_s6 = inlined_call_operand.vmem [shape: f32[256,32], index: 6, kind: input, shape index: {}]   ;;  %s3572_s7 = inlined_call_operand.vmem [shape: f32[1,32], index: 7, kind: input, shape index: {}]   ;;  %s3573_s8 = inlined_call_operand.vmem [shape: f32[1,32], index: 8, kind: input, shape index: {}]   ;;  %s3574_s9 = inlined_call_operand.vmem [shape: f32[32,32], index: 9, kind: input, shape index: {}]   ;;  %s3575_s10 = inlined_call_operand.vmem [shape: f32[32,1], index: 10, kind: input, shape index: {}]   ;;  %s3576_s11 = inlined_call_operand.vmem [shape: f32[2,32,256], index: 11, kind: output, shape index: {0}]   ;;  %s3577_s12 = inlined_call_operand.vmem [shape: f32[2,32,1], index: 12, kind: output, shape index: {1}]  }
   0x1 LB: > { %s2148_s22 = sadd.s32 4294967295, %s2521_s21   ;;  %p2152_p0 = scmp.ge.s32.totalorder %s2521_s21, 1  ;;  %s2521_s21 = sphi %s2590_s21, %s23_s21  }
   0x2   : > { %p375_p1 = scmp.lt.s32.totalorder %s2521_s21, 3 }
   0x4   : > { %p376_p2 = pnand %p2152_p0, %p375_p1 }
   0x6   : > { %379 = sbr.rel (%p376_p2) target bundleno = 1128 (0x468), region = 64 }
   0xd   : > { %p427_p3 = scmp.lt.s32.totalorder %s2148_s22, 1  ;;  %v447_v0 = vld [vmem:[%s3567_s2] sm:$0xff]  ;;  %vm565_vm0 = vcmask 261120   ;;  %v3578_v1 = vmov 0.0   ;;  %v2524_v2 = vmov 0   ;;  %v2608_v3 = vld [vmem:[%s3568_s3 + $0x28] sm:$0xff] }
   0xe   : > { %654 = vmatprep.mubr.f32.mxu0 %v3578_v1  ;;  %2277 = vmatprep.mubr.msk.f32.mxu1 %vm565_vm0, %v447_v0  ;;  %v2614_v4 = vld [vmem:[%s3568_s3 + $0x30] sm:$0xff]  ;;  %v2622_v5 = vld [vmem:[%s3568_s3 + $0x20] sm:$0xff]  ;;  %v2637_v6 = vld [vmem:[%s3568_s3 + $0x38] sm:$0xff]  ;;  %vm1557_vm7 = vcmask 7168  }
   0xf   : > { %s3588_s22 = smov (!%p427_p3, %s2148_s22), 1  ;;  %2399 = vset.pattern.permute.xlu0 %v2524_v2  ;;  %2400 = vset.pattern.permute.xlu1 %v2524_v2  ;;  %v463_v14 = vld [vmem:[%s3569_s4] sm:$0xff]  ;;  %v464_v27 = vld [vmem:[%s3569_s4 + $0x8] sm:$0xff]  ;;  %v449_v30 = vld [vmem:[%s3567_s2 + $0x10] sm:$0xff] }
  0x10   : > { %552 = vperm.xlu0 %2399, %v2608_v3   ;;  %s2193_s29 = sshll.u32 %s3588_s22, 6  ;;  %s2194_s30 = sshll.u32 %s3588_s22, 5  ;;  %557 = vperm.xlu1 %2400, %v2614_v4   ;;  %v467_v26 = vld [vmem:[%s3570_s5] sm:$0xff]  ;;  %v468_v28 = vld [vmem:[%s3570_s5 + $0x8] sm:$0xff]  ;;  %v465_v31 = vld [vmem:[%s3569_s4 + $0x10] sm:$0xff] }
  0x11   : > { %s431_s17 = scalar_lea.vmem %s3565_s0, %s2193_s29  ;;  %s436_s20 = scalar_lea.vmem %s3566_s1, %s2194_s30  ;;  %v448_v29 = vld [vmem:[%s3567_s2 + $0x8] sm:$0xff]  ;;  %v469_v32 = vld [vmem:[%s3570_s5 + $0x10] sm:$0xff]  ;;  %v450_v33 = vld [vmem:[%s3567_s2 + $0x18] sm:$0xff] }
  0x12   : > { %v514_v7 = vld [vmem:[%s431_s17 + $0x8] sm:$0xff]  ;;  %v516_v8 = vld [vmem:[%s431_s17 + $0x18] sm:$0xff]  ;;  %v521_v9 = vld [vmem:[%s436_s20] sm:$0xff]  ;;  %s446_s19 = scalar_lea.vmem %s3577_s12, %s2194_s30 }
  0x13   : > { %v2317_v10 = vpack.c.bf16 %v516_v8, %v514_v7  ;;  %v522_v11 = vld [vmem:[%s436_s20 + $0x8] sm:$0xff]  ;;  %v513_v12 = vld [vmem:[%s431_s17] sm:$0xff]  ;;  %v515_v13 = vld [vmem:[%s431_s17 + $0x10] sm:$0xff] }
  0x14   : > { %547 = vperm.xlu0 %2399, %v2622_v5   ;;  %v2325_v15 = vpack.c.bf16 %v522_v11, %v521_v9  ;;  %v2319_v16 = vpack.c.bf16 %v515_v13, %v513_v12  ;;  %v518_v17 = vld [vmem:[%s431_s17 + $0x28] sm:$0xff]  ;;  %v520_v18 = vld [vmem:[%s431_s17 + $0x38] sm:$0xff]  ;;  %v523_v19 = vld [vmem:[%s436_s20 + $0x10] sm:$0xff]  ;;  %562 = vperm.xlu1 %2400, %v2637_v6  }
  0x15   : > { %2318 = vmatprep.subr.bf16.mxu0 %v2317_v10  ;;  %v2321_v20 = vpack.c.bf16 %v520_v18, %v518_v17  ;;  %v524_v21 = vld [vmem:[%s436_s20 + $0x18] sm:$0xff]  ;;  %v517_v22 = vld [vmem:[%s431_s17 + $0x20] sm:$0xff]  ;;  %v519_v23 = vld [vmem:[%s431_s17 + $0x30] sm:$0xff]  ;;  %s441_s17 = scalar_lea.vmem %s3576_s11, %s2193_s29 }
  0x16   : > { %2326 = vmatprep.subr.bf16.mxu1 %v2325_v15  ;;  %2320 = vmatpush1.bf16.msra.mxu0 %v2319_v16  ;;  %v2329_v24 = vpack.c.bf16 %v524_v21, %v523_v19  ;;  %v2323_v25 = vpack.c.bf16 %v519_v23, %v517_v22  ;;  %v451_v34 = vld [vmem:[%s3567_s2 + $0x20] sm:$0xff]  ;;  %v466_v35 = vld [vmem:[%s3569_s4 + $0x18] sm:$0xff]  ;;  %v452_v37 = vld [vmem:[%s3567_s2 + $0x28] sm:$0xff] }
  0x17   : > { %2328 = vmatpush3.bf16.msra.mxu1 %v2325_v15  ;;  %2322 = vmatprep.subr.bf16.mxu0 %v2321_v20  ;;  %v470_v36 = vld [vmem:[%s3570_s5 + $0x18] sm:$0xff]  ;;  %v453_v38 = vld [vmem:[%s3567_s2 + $0x30] sm:$0xff]  ;;  %v456_v40 = vld [vmem:[%s3568_s3 + $0x8] sm:$0xff] }
  0x18   : > { %2330 = vmatprep.subr.bf16.mxu1 %v2329_v24  ;;  %1503 = vperm.xlu0 %2399, %v463_v14   ;;  %v454_v39 = vld [vmem:[%s3567_s2 + $0x38] sm:$0xff]  ;;  %v455_v42 = vld [vmem:[%s3568_s3] sm:$0xff]  ;;  %v457_v51 = vld [vmem:[%s3568_s3 + $0x10] sm:$0xff] }
  0x19   : > { %1531 = vperm.xlu1 %2400, %v467_v26   ;;  %v458_v48 = vld [vmem:[%s3568_s3 + $0x18] sm:$0xff] }
  0x1a   : > { %2324 = vmatpush1.bf16.msra.mxu0 %v2323_v25 }
  0x1b   : > { %2332 = vmatpush3.bf16.msra.mxu1 %v2329_v24 }
  0x1c   : > { %1508 = vperm.xlu0 %2399, %v464_v27  }
  0x1d   : > { %2161 = vmatmul.mubr.msk.f32.vlgmr.msra.gmra.mrb[0].mxu0 %vm565_vm0, %v447_v0  ;;  %1536 = vperm.xlu1 %2400, %v468_v28  }
  0x1e   : > { %2278 = vmatmul.mubr.msk.f32.vlgmr.msra.gmra.mrb[0].mxu1 %vm565_vm0, %v448_v29  ;;  %660 = vmatprep.mubr.f32.mxu0 %v3578_v1 }
  0x1f   : > { %2280 = vmatprep.mubr.msk.f32.mxu1 %vm565_vm0, %v449_v30 }
  0x20   : > { %1513 = vperm.xlu0 %2399, %v465_v31  }
  0x21   : > { %2162 = vmatmul.mubr.msk.f32.gmra.mrb[2].mxu0 %vm565_vm0, %v448_v29  ;;  %1541 = vperm.xlu1 %2400, %v469_v32  }
  0x22   : > { %2281 = vmatmul.mubr.msk.f32.gmra.mrb[2].mxu1 %vm565_vm0, %v450_v33  ;;  %666 = vmatprep.mubr.f32.mxu0 %v3578_v1 }
  0x23   : > { %2283 = vmatprep.mubr.msk.f32.mxu1 %vm565_vm0, %v451_v34 }
  0x24   : > { %1518 = vperm.xlu0 %2399, %v466_v35  }
  0x25   : > { %2163 = vmatmul.mubr.msk.f32.gmra.mrb[4].mxu0 %vm565_vm0, %v449_v30  ;;  %1546 = vperm.xlu1 %2400, %v470_v36  }
  0x26   : > { %2284 = vmatmul.mubr.msk.f32.gmra.mrb[4].mxu1 %vm565_vm0, %v452_v37  ;;  %672 = vmatprep.mubr.f32.mxu0 %v3578_v1 }
  0x27   : > { %2286 = vmatprep.mubr.msk.f32.mxu1 %vm565_vm0, %v453_v38 }
  0x29   : > { %2164 = vmatmul.mubr.msk.f32.gmra.mrb[6].mxu0 %vm565_vm0, %v450_v33 }
  0x2a   : > { %2287 = vmatmul.mubr.msk.f32.gmra.mrb[6].mxu1 %vm565_vm0, %v454_v39  ;;  %678 = vmatprep.mubr.f32.mxu0 %v3578_v1 }
  0x2d   : > { %2165 = vmatmul.mubr.msk.f32.gmra.mrb[8].mxu0 %vm565_vm0, %v451_v34 }
  0x2e   : > { %684 = vmatprep.mubr.f32.mxu0 %v3578_v1 }
  0x31   : > { %2166 = vmatmul.mubr.msk.f32.gmra.mrb[10].mxu0 %vm565_vm0, %v452_v37 }
  0x32   : > { %690 = vmatprep.mubr.f32.mxu0 %v3578_v1 }
  0x35   : > { %2167 = vmatmul.mubr.msk.f32.gmra.mrb[12].mxu0 %vm565_vm0, %v453_v38 }
  0x36   : > { %696 = vmatprep.mubr.f32.mxu0 %v3578_v1 }
  0x39   : > { %2168 = vmatmul.mubr.msk.f32.gmra.mrb[14].mxu0 %vm565_vm0, %v454_v39 }
  0xf0   : > { %v2711_v41 = vpop.f32.mrb[0].mxu0 }
  0xf1   : > { %v2716_v43 = vpop.f32.mrb[1].mxu0  ;;  %v2279_v44 = vpop.f32.mrb[0].mxu1 }
  0xf2   : > { %v2718_v45 = vadd.f32 %v2279_v44, %v456_v40  ;;  %v1185_v46 = vpop.f32.mrb[1].mxu1 }
  0xf3   : > { %v2720_v47 = vadd.f32 %v1185_v46, %v455_v42 }
  0xf4   : > { %v2725_v49 = vpop.f32.mrb[2].mxu0  ;;  %v2728_v50 = vmul.f32 0.70710677, %v2718_v45 }
  0xf5   : > { %v2733_v52 = vpop.f32.mrb[3].mxu0  ;;  %v2736_v53 = vmul.f32 0.70710677, %v2720_v47  ;;  %v2282_v54 = vpop.f32.mrb[2].mxu1 }
  0xf6   : > { %v1241_v55 = vand.u32 2147483647, %v2728_v50  ;;  %v2739_v56 = vadd.f32 %v2282_v54, %v458_v48  ;;  %v1195_v57 = vpop.f32.mrb[3].mxu1  ;;  %vm1393_vm1 = vcmp.lt.f32.partialorder %v2728_v50, 0.0 }
  0xf7   : > { %v1240_v58 = vand.u32 2147483647, %v2736_v53  ;;  %v2742_v59 = vadd.f32 %v1195_v57, %v457_v51  ;;  %vm1392_vm2 = vcmp.lt.f32.partialorder %v2736_v53, 0.0 }
  0xf8   : > { %v1249_v60 = vmul.f32 0.3275911, %v1241_v55  ;;  %v2744_v61 = vpop.f32.mrb[4].mxu0  ;;  %v2747_v63 = vmul.f32 0.70710677, %v2739_v56  ;;  %v1345_v7 = vsub.f32 0.0, %v1241_v55 }
  0xf9   : > { %v1248_v62 = vmul.f32 0.3275911, %v1240_v58  ;;  %v2749_v0 = vpop.f32.mrb[5].mxu0  ;;  %v2752_v8 = vmul.f32 0.70710677, %v2742_v59  ;;  %v2285_v9 = vpop.f32.mrb[4].mxu1 }
  0xfa   : > { %3580 = vst [vmem:[#allocation2_spill] sm:$0xff] %v2749_v0  ;;  %v1257_v2 = vadd.f32 1.0, %v1249_v60  ;;  %v1243_v11 = vand.u32 2147483647, %v2747_v63  ;;  %v1205_v12 = vpop.f32.mrb[5].mxu1  ;;  %v1344_v15 = vsub.f32 0.0, %v1240_v58  ;;  %v1353_v18 = vmul.f32 %v1345_v7, %v1241_v55 }
  0xfb   : > { %v1256_v10 = vadd.f32 1.0, %v1248_v62  ;;  %v1242_v13 = vand.u32 2147483647, %v2752_v8  ;;  %v2759_v20 = vadd.f32 %v2285_v9, %v2608_v3  ;;  %v2764_v24 = vadd.f32 %v1205_v12, %v2622_v5 }
  0xfc   : > { %2401 = vrcp.f32 %v1257_v2  ;;  %v2756_v14 = vpop.f32.mrb[6].mxu0  ;;  %v1251_v16 = vmul.f32 0.3275911, %v1243_v11  ;;  %v1347_v25 = vsub.f32 0.0, %v1243_v11  ;;  %v1352_v29 = vmul.f32 %v1344_v15, %v1240_v58 }
  0xfd   : > { %3581 = vst [vmem:[#allocation3_spill] sm:$0xff] %v2756_v14  ;;  %2403 = vrcp.f32 %v1256_v10  ;;  %v2288_v17 = vpop.f32.mrb[6].mxu1  ;;  %v1250_v19 = vmul.f32 0.3275911, %v1242_v13  ;;  %v2761_v21 = vpop.f32.mrb[7].mxu0  ;;  %v1346_v5 = vsub.f32 0.0, %v1242_v13 }
  0xfe   : > { %3582 = vst [vmem:[#allocation4_spill] sm:$0xff] %v2761_v21  ;;  %v1215_v22 = vpop.f32.mrb[7].mxu1  ;;  %v1259_v23 = vadd.f32 1.0, %v1251_v16  ;;  %v2767_v27 = vmul.f32 0.70710677, %v2759_v20  ;;  %v2779_v34 = vadd.f32 %v2288_v17, %v2637_v6  ;;  %v1355_v35 = vmul.f32 %v1347_v25, %v1243_v11 }
  0xff   : > { %v1258_v26 = vadd.f32 1.0, %v1250_v19  ;;  %v2772_v30 = vmul.f32 0.70710677, %v2764_v24  ;;  %v1362_v31 = vmul.f32 1.442695, %v1353_v18  ;;  %v2782_v37 = vadd.f32 %v1215_v22, %v2614_v4 }
 0x100   : > { %v2769_v28 = vpop.f32.mrb[8].mxu0  ;;  %2405 = vrcp.f32 %v1259_v23  ;;  %v1245_v32 = vand.u32 2147483647, %v2767_v27  ;;  %v1360_v39 = vmul.f32 1.442695, %v1352_v29  ;;  %v1354_v55 = vmul.f32 %v1346_v5, %v1242_v13 }
 0x101   : > { %v2774_v3 = vpop.f32.mrb[9].mxu0  ;;  %2407 = vrcp.f32 %v1258_v26  ;;  %v1244_v33 = vand.u32 2147483647, %v2772_v30  ;;  %v2787_v42 = vmul.f32 0.70710677, %v2779_v34  ;;  %v2801_v60 = vmul.f32 0.5, %v2718_v45 }
 0x102   : > { %v1253_v36 = vmul.f32 0.3275911, %v1245_v32  ;;  %2409 = vpow2.f32 %v1362_v31  ;;  %v1349_v48 = vsub.f32 0.0, %v1245_v32  ;;  %v2792_v6 = vmul.f32 0.70710677, %v2782_v37 }
 0x103   : > { %v1252_v40 = vmul.f32 0.3275911, %v1244_v33  ;;  %v1247_v58 = vand.u32 2147483647, %v2787_v42  ;;  %v1366_v2 = vmul.f32 1.442695, %v1355_v35 }
 0x104   : > { %v2784_v38 = vpop.f32.mrb[10].mxu0  ;;  %v1261_v46 = vadd.f32 1.0, %v1253_v36  ;;  %v2807_v10 = vmul.f32 0.5, %v2720_v47  ;;  %v1357_v13 = vmul.f32 %v1349_v48, %v1245_v32  ;;  %v1348_v15 = vsub.f32 0.0, %v1244_v33  ;;  %v2830_v36 = vpop.permute.xlu0 %552 }
 0x105   : > { %v2794_v51 = vpop.f32.mrb[11].mxu0  ;;  %v1260_v57 = vadd.f32 1.0, %v1252_v40  ;;  %v1255_v11 = vmul.f32 0.3275911, %v1247_v58  ;;  %v2810_v16 = vand.u32 2147483647, %v2792_v6 }
 0x106   : > { %v2789_v44 = vpop.eup %2401  ;;  %2411 = vrcp.f32 %v1261_v46  ;;  %v1364_v19 = vmul.f32 1.442695, %v1354_v55  ;;  %v2825_v32 = vmul.f32 0.5, %v2739_v56  ;;  %v1370_v46 = vmul.f32 1.442695, %v1357_v13 }
 0x107   : > { %v2796_v54 = vpop.eup %2403  ;;  %v1273_v4 = vmul.f32 1.0614054, %v2789_v44  ;;  %2413 = vrcp.f32 %v1260_v57  ;;  %v1263_v22 = vadd.f32 1.0, %v1255_v11  ;;  %v1254_v26 = vmul.f32 0.3275911, %v2810_v16 }
 0x108   : > { %v1272_v62 = vmul.f32 1.0614054, %v2796_v54  ;;  %v2804_v7 = vpop.f32.mrb[12].mxu0  ;;  %2415 = vpow2.f32 %v1360_v39  ;;  %v1356_v48 = vmul.f32 %v1348_v15, %v1244_v33  ;;  %v1351_v57 = vsub.f32 0.0, %v1247_v58 }
 0x109   : > { %v1281_v9 = vadd.f32 -1.4531521, %v1273_v4  ;;  %v2812_v45 = vpop.f32.mrb[13].mxu0  ;;  %2417 = vpow2.f32 %v1366_v2  ;;  %v2836_v11 = vmul.f32 0.5, %v2742_v59  ;;  %v2840_v13 = vmul.f32 0.5, %v2759_v20 }
 0x10a   : > { %v1280_v12 = vadd.f32 -1.4531521, %v1272_v62  ;;  %v2814_v17 = vpop.eup %2405  ;;  %2419 = vrcp.f32 %v1263_v22  ;;  %v1262_v62 = vadd.f32 1.0, %v1254_v26  ;;  %vm1397_vm3 = vcmp.lt.f32.partialorder %v2767_v27, 0.0 }
 0x10b   : > { %v1289_v18 = vmul.f32 %v2789_v44, %v1281_v9  ;;  %v2817_v23 = vpop.eup %2407  ;;  %v1275_v25 = vmul.f32 1.0614054, %v2814_v17  ;;  %2421 = vpow2.f32 %v1364_v19  ;;  %vm1396_vm4 = vcmp.lt.f32.partialorder %v2772_v30, 0.0 }
 0x10c   : > { %v1288_v47 = vmul.f32 %v2796_v54, %v1280_v12  ;;  %v2822_v29 = vpop.f32.mrb[14].mxu0  ;;  %v1274_v5 = vmul.f32 1.0614054, %v2817_v23  ;;  %v2410_v2 = vpop.eup %2409  ;;  %2423 = vrcp.f32 %v1262_v62  ;;  %vm1395_vm5 = vcmp.lt.f32.partialorder %v2747_v63, 0.0 }
 0x10d   : > { %v1297_v31 = vadd.f32 1.4214138, %v1289_v18  ;;  %v2828_v35 = vpop.f32.mrb[15].mxu0  ;;  %v1283_v40 = vadd.f32 -1.4531521, %v1275_v25  ;;  %2425 = vpow2.f32 %v1370_v46  ;;  %vm1394_vm6 = vcmp.lt.f32.partialorder %v2752_v8, 0.0 }
 0x10e   : > { %v1296_v39 = vadd.f32 1.4214138, %v1288_v47  ;;  %v1282_v55 = vadd.f32 -1.4531521, %v1274_v5  ;;  %v1368_v47 = vmul.f32 1.442695, %v1356_v48  ;;  %v2848_v5 = vpop.permute.xlu0 %547 }
 0x10f   : > { %v1305_v4 = vmul.f32 %v2789_v44, %v1297_v31  ;;  %v1291_v9 = vmul.f32 %v2814_v17, %v1283_v40  ;;  %v1359_v31 = vmul.f32 %v1351_v57, %v1247_v58  ;;  %vm1399_vm8 = vcmp.lt.f32.partialorder %v2787_v42, 0.0 }
 0x110   : > { %v1304_v56 = vmul.f32 %v2796_v54, %v1296_v39  ;;  %v1290_v18 = vmul.f32 %v2817_v23, %v1282_v55  ;;  %v2842_v33 = vpop.eup %2411  ;;  %2427 = vpow2.f32 %v1368_v47  ;;  %vm1398_vm9 = vcmp.lt.f32.partialorder %v2792_v6, 0.0 }
 0x111   : > { %v1313_v12 = vadd.f32 -0.28449672, %v1305_v4  ;;  %v1299_v22 = vadd.f32 1.4214138, %v1291_v9  ;;  %v2844_v25 = vpop.eup %2413  ;;  %v1277_v19 = vmul.f32 1.0614054, %v2842_v33 }
 0x112   : > { %v1312_v15 = vadd.f32 -0.28449672, %v1304_v56  ;;  %v1298_v59 = vadd.f32 1.4214138, %v1290_v18  ;;  %v1276_v40 = vmul.f32 1.0614054, %v2844_v25  ;;  %v2416_v46 = vpop.eup %2415  ;;  %v681_v56 = vadd.f32 %v2769_v28, %v2848_v5 }
 0x113   : > { %v1321_v26 = vmul.f32 %v2789_v44, %v1313_v12  ;;  %v1307_v39 = vmul.f32 %v2814_v17, %v1299_v22  ;;  %v1350_v4 = vsub.f32 0.0, %v2810_v16  ;;  %v1285_v62 = vadd.f32 -1.4531521, %v1277_v19  ;;  %v2418_v9 = vpop.eup %2417 }
 0x114   : > { %v1320_v20 = vmul.f32 %v2796_v54, %v1312_v15  ;;  %v1306_v55 = vmul.f32 %v2817_v23, %v1298_v59  ;;  %v1284_v12 = vadd.f32 -1.4531521, %v1276_v40  ;;  %v2857_v18 = vpop.eup %2419  ;;  %v1374_v21 = vmul.f32 1.442695, %v1359_v31 }
 0x115   : > { %v1329_v48 = vadd.f32 0.2548296, %v1321_v26  ;;  %v1315_v57 = vadd.f32 -0.28449672, %v1307_v39  ;;  %v1293_v1 = vmul.f32 %v2842_v33, %v1285_v62  ;;  %v1279_v28 = vmul.f32 1.0614054, %v2857_v18 }
 0x116   : > { %v1328_v58 = vadd.f32 0.2548296, %v1320_v20  ;;  %v1314_v22 = vadd.f32 -0.28449672, %v1306_v55  ;;  %v1292_v19 = vmul.f32 %v2844_v25, %v1284_v12  ;;  %v2867_v40 = vmul.f32 0.70710677, %v681_v56 }
 0x117   : > { %v1337_v15 = vmul.f32 %v2789_v44, %v1329_v48  ;;  %v1323_v59 = vmul.f32 %v2814_v17, %v1315_v57  ;;  %v1301_v39 = vadd.f32 1.4214138, %v1293_v1  ;;  %v2422_v44 = vpop.eup %2421  ;;  %v1287_v55 = vadd.f32 -1.4531521, %v1279_v28 }
 0x118   : > { %v1336_v26 = vmul.f32 %v2796_v54, %v1328_v58  ;;  %v1322_v47 = vmul.f32 %v2817_v23, %v1314_v22  ;;  %v1300_v54 = vadd.f32 1.4214138, %v1292_v19  ;;  %v2870_v62 = vpop.eup %2423  ;;  %v1358_v12 = vmul.f32 %v1350_v4, %v2810_v16 }
 0x119   : > { %v1377_v20 = vmul.f32 %v2410_v2, %v1337_v15  ;;  %v1331_v31 = vadd.f32 0.2548296, %v1323_v59  ;;  %v1309_v57 = vmul.f32 %v2842_v33, %v1301_v39  ;;  %v2874_v2 = vmul.f32 0.5, %v2764_v24  ;;  %v2426_v1 = vpop.eup %2425 }
 0x11a   : > { %v1376_v48 = vmul.f32 %v2416_v46, %v1336_v26  ;;  %v1330_v58 = vadd.f32 0.2548296, %v1322_v47  ;;  %v1308_v22 = vmul.f32 %v2844_v25, %v1300_v54  ;;  %v2879_v46 = vmul.f32 0.5, %v2779_v34  ;;  %v2428_v14 = vpop.eup %2427 }
 0x11b   : > { %v1385_v15 = vsub.f32 1.0, %v1377_v20  ;;  %v1295_v26 = vmul.f32 %v2857_v18, %v1287_v55  ;;  %v1339_v19 = vmul.f32 %v2814_v17, %v1331_v31  ;;  %v1317_v28 = vadd.f32 -0.28449672, %v1309_v57 }
 0x11c   : > { %v1384_v59 = vsub.f32 1.0, %v1376_v48  ;;  %v1278_v47 = vmul.f32 1.0614054, %v2870_v62  ;;  %v1316_v39 = vadd.f32 -0.28449672, %v1308_v22  ;;  %2429 = vpow2.f32 %v1374_v21 }
 0x11d   : > { %v1303_v24 = vadd.f32 1.4214138, %v1295_v26  ;;  %v743_v16 = vand.u32 2147483647, %v2867_v40  ;;  %v1338_v4 = vmul.f32 %v2817_v23, %v1330_v58  ;;  %v1325_v20 = vmul.f32 %v2842_v33, %v1317_v28 }
 0x11e   : > { %v1286_v54 = vadd.f32 -1.4531521, %v1278_v47  ;;  %v1372_v34 = vmul.f32 1.442695, %v1358_v12  ;;  %v1401_v0 = vsub.f32 0.0, %v1385_v15  ;;  %v1324_v17 = vmul.f32 %v2844_v25, %v1316_v39 }
 0x11f   : > { %v2890_v48 = vmul.f32 0.5, %v2782_v37  ;;  %v2892_v31 = vmul.f32 0.5, %v681_v56  ;;  %v1400_v21 = vsub.f32 0.0, %v1384_v59  ;;  %v1379_v55 = vmul.f32 %v2418_v9, %v1339_v19 }
 0x120   : > { %v1333_v57 = vadd.f32 0.2548296, %v1325_v20  ;;  %v1311_v23 = vmul.f32 %v2857_v18, %v1303_v24  ;;  %v1332_v58 = vadd.f32 0.2548296, %v1324_v17  ;;  %v1294_v12 = vmul.f32 %v2870_v62, %v1286_v54 }
 0x121   : > { %v951_v22 = vsub.f32 0.0, %v743_v16  ;;  %v2899_v26 = vadd.f32 %v2774_v3, %v2848_v5  ;;  %v1378_v37 = vmul.f32 %v2422_v44, %v1338_v4  ;;  %2431 = vpow2.f32 %v1372_v34 }
 0x122   : > { %v1341_v56 = vmul.f32 %v2842_v33, %v1333_v57  ;;  %v1319_v28 = vadd.f32 -0.28449672, %v1311_v23  ;;  %v1409_v9 = vsel %vm1393_vm1, %v1401_v0, %v1385_v15  ;;  %v1340_v19 = vmul.f32 %v2844_v25, %v1332_v58 }
 0x123   : > { %v1302_v47 = vadd.f32 1.4214138, %v1294_v12  ;;  %v2909_v39 = vadd.f32 %v2784_v38, %v2830_v36  ;;  %v1408_v3 = vsel %vm1392_vm2, %v1400_v21, %v1384_v59  ;;  %v1387_v5 = vsub.f32 1.0, %v1379_v55 }
 0x124   : > { %v1381_v44 = vmul.f32 %v2426_v1, %v1341_v56  ;;  %v1327_v33 = vmul.f32 %v2857_v18, %v1319_v28  ;;  %v1380_v24 = vmul.f32 %v2428_v14, %v1340_v19  ;;  %v967_v0 = vmul.f32 %v951_v22, %v743_v16 }
 0x125   : > { %v1310_v50 = vmul.f32 %v2870_v62, %v1302_v47  ;;  %v759_v25 = vmul.f32 0.3275911, %v743_v16  ;;  %v1417_v15 = vadd.f32 1.0, %v1409_v9  ;;  %v1386_v4 = vsub.f32 1.0, %v1378_v37 }
 0x126   : > { %v1389_v20 = vsub.f32 1.0, %v1381_v44  ;;  %v1335_v38 = vadd.f32 0.2548296, %v1327_v33  ;;  %v2430_v54 = vpop.eup %2429  ;;  %v1416_v34 = vadd.f32 1.0, %v1408_v3  ;;  %v1388_v53 = vsub.f32 1.0, %v1380_v24 }
 0x127   : > { %v1318_v59 = vadd.f32 -0.28449672, %v1310_v50  ;;  %v775_v17 = vadd.f32 1.0, %v759_v25  ;;  %v1403_v1 = vsub.f32 0.0, %v1387_v5  ;;  %v2918_v14 = vmul.f32 0.70710677, %v2899_v26 }
 0x128   : > { %v1405_v21 = vsub.f32 0.0, %v1389_v20  ;;  %v1343_v55 = vmul.f32 %v2857_v18, %v1335_v38  ;;  %v1404_v57 = vsub.f32 0.0, %v1388_v53  ;;  %v2922_v16 = vmul.f32 0.70710677, %v2909_v39 }
 0x129   : > { %v1326_v23 = vmul.f32 %v2870_v62, %v1318_v59  ;;  %2433 = vrcp.f32 %v775_v17  ;;  %v1402_v58 = vsub.f32 0.0, %v1386_v4  ;;  %v744_v37 = vand.u32 2147483647, %v2918_v14 }
 0x12a   : > { %v1413_v12 = vsel %vm1397_vm3, %v1405_v21, %v1389_v20  ;;  %v1383_v22 = vmul.f32 %v2430_v54, %v1343_v55  ;;  %v1412_v56 = vsel %vm1396_vm4, %v1404_v57, %v1388_v53  ;;  %v745_v9 = vand.u32 2147483647, %v2922_v16 }
 0x12b   : > { %v1421_v18 = vadd.f32 1.0, %v1413_v12  ;;  %v1334_v28 = vadd.f32 0.2548296, %v1326_v23  ;;  %v2432_v19 = vpop.eup %2431  ;;  %v1420_v47 = vadd.f32 1.0, %v1412_v56  ;;  %v952_v44 = vsub.f32 0.0, %v744_v37 }
 0x12c   : > { %v1391_v3 = vsub.f32 1.0, %v1383_v22  ;;  %v760_v33 = vmul.f32 0.3275911, %v744_v37  ;;  %v1411_v27 = vsel %vm1395_vm5, %v1403_v1, %v1387_v5  ;;  %v761_v25 = vmul.f32 0.3275911, %v745_v9  ;;  %v558_v1 = vpop.permute.xlu1 %557 }
 0x12d   : > { %v2934_v24 = vmul.f32 %v1421_v18, %v2840_v13  ;;  %v1342_v50 = vmul.f32 %v2870_v62, %v1334_v28  ;;  %v1410_v30 = vsel %vm1394_vm6, %v1402_v58, %v1386_v4  ;;  %v2940_v20 = vmul.f32 %v1420_v47, %v2874_v2 }
 0x12e   : > { %v1407_v38 = vsub.f32 0.0, %v1391_v3  ;;  %v776_v54 = vadd.f32 1.0, %v760_v33  ;;  %v777_v63 = vadd.f32 1.0, %v761_v25  ;;  %v953_v5 = vsub.f32 0.0, %v745_v9 }
 0x12f   : > { %v1559_v53 = vsel %vm1557_vm7, %v2934_v24, 0.0  ;;  %v1382_v59 = vmul.f32 %v2432_v19, %v1342_v50  ;;  %v1558_v13 = vsel %vm1557_vm7, %v2940_v20, 0.0  ;;  %v968_v17 = vmul.f32 %v952_v44, %v744_v37 }
 0x130   : > { %v1415_v62 = vsel %vm1399_vm8, %v1407_v38, %v1391_v3  ;;  %2435 = vrcp.f32 %v776_v54  ;;  %v1560_v8 = vadd.f32 %v1559_v53, %v1558_v13  ;;  %v2949_v21 = vmul.f32 %v1417_v15, %v2801_v60 }
 0x131   : > { %v1423_v4 = vadd.f32 1.0, %v1415_v62  ;;  %v1390_v2 = vsub.f32 1.0, %v1382_v59  ;;  %2437 = vrcp.f32 %v777_v63  ;;  %v2952_v55 = vmul.f32 %v1416_v34, %v2807_v10 }
 0x132   : > { %v991_v57 = vmul.f32 1.442695, %v967_v0  ;;  %v689_v23 = vadd.f32 %v2794_v51, %v2830_v36  ;;  %v1419_v42 = vadd.f32 1.0, %v1411_v27  ;;  %v2959_v22 = vadd.f32 %v2804_v7, %v558_v1 }
 0x133   : > { %v2956_v58 = vpop.eup %2433  ;;  %v1406_v12 = vsub.f32 0.0, %v1390_v2  ;;  %v2962_v37 = vadd.f32 %v2812_v45, %v558_v1  ;;  %v1418_v18 = vadd.f32 1.0, %v1410_v30  ;;  %v969_v15 = vmul.f32 %v953_v5, %v745_v9 }
 0x134   : > { %v807_v60 = vmul.f32 1.0614054, %v2956_v58  ;;  %v2965_v10 = vmul.f32 0.70710677, %v689_v23  ;;  %v2968_v0 = vmul.f32 %v1423_v4, %v2879_v46  ;;  %v993_v36 = vmul.f32 1.442695, %v968_v17 }
 0x135   : > { %v1414_v51 = vsel %vm1398_vm9, %v1406_v12, %v1390_v2  ;;  %v2973_v34 = vmul.f32 0.70710677, %v2959_v22  ;;  %2439 = vpow2.f32 %v991_v57  ;;  %v2977_v28 = vmul.f32 %v1419_v42, %v2825_v32  ;;  %v563_v57 = vpop.permute.xlu1 %562 }
 0x136   : > { %v1422_v7 = vadd.f32 1.0, %v1414_v51  ;;  %v823_v45 = vadd.f32 -1.4531521, %v807_v60  ;;  %v746_v56 = vand.u32 2147483647, %v2965_v10  ;;  %v2980_v9 = vmul.f32 0.5, %v2899_v26 }
 0x137   : > { %v747_v46 = vand.u32 2147483647, %v2973_v34  ;;  %v2984_v6 = vmul.f32 0.70710677, %v2962_v37  ;;  %v2987_v19 = vmul.f32 %v1418_v18, %v2836_v11  ;;  %v1563_v32 = vsel %vm1557_vm7, %v2968_v0, 0.0 }
 0x138   : > { %v2990_v47 = vmul.f32 %v1422_v7, %v2890_v48  ;;  %v839_v3 = vmul.f32 %v2956_v58, %v823_v45  ;;  %v762_v44 = vmul.f32 0.3275911, %v746_v56  ;;  %2441 = vpow2.f32 %v993_v36 }
 0x139   : > { %v995_v26 = vmul.f32 1.442695, %v969_v15  ;;  %v763_v33 = vmul.f32 0.3275911, %v747_v46  ;;  %v954_v30 = vsub.f32 0.0, %v746_v56  ;;  %v955_v13 = vsub.f32 0.0, %v747_v46 }
 0x13a   : > { %v2995_v27 = vpop.eup %2435  ;;  %v1561_v50 = vsel %vm1557_vm7, %v2990_v47, 0.0  ;;  %v855_v25 = vadd.f32 1.4214138, %v839_v3  ;;  %v778_v11 = vadd.f32 1.0, %v762_v44  ;;  %v748_v59 = vand.u32 2147483647, %v2984_v6 }
 0x13b   : > { %v2999_v38 = vpop.eup %2437  ;;  %v1562_v48 = vadd.f32 %v1561_v50, %v1560_v8  ;;  %v808_v54 = vmul.f32 1.0614054, %v2995_v27  ;;  %v779_v53 = vadd.f32 1.0, %v763_v33  ;;  %v3006_v4 = vmul.f32 0.5, %v2909_v39  ;;  %v487_v15 = vld [vmem:[%s3571_s6 + $0x80] sm:$0xff]  ;;  %v488_v39 = vld [vmem:[%s3571_s6 + $0x88] sm:$0xff] }
 0x13c   : > { %v871_v63 = vmul.f32 %v2956_v58, %v855_v25  ;;  %v809_v5 = vmul.f32 1.0614054, %v2999_v38  ;;  %2443 = vrcp.f32 %v778_v11  ;;  %v970_v8 = vmul.f32 %v954_v30, %v746_v56 }
 0x13d   : > { %v1564_v62 = vadd.f32 %v1563_v32, %v1562_v48  ;;  %v824_v17 = vadd.f32 -1.4531521, %v808_v54  ;;  %2445 = vrcp.f32 %v779_v53  ;;  %v3009_v18 = vmul.f32 0.5, %v689_v23 }
 0x13e   : > { %v887_v2 = vadd.f32 -0.28449672, %v871_v63  ;;  %v825_v1 = vadd.f32 -1.4531521, %v809_v5  ;;  %2447 = vpow2.f32 %v995_v26  ;;  %v764_v60 = vmul.f32 0.3275911, %v748_v59 }
 0x13f   : > { %v1565_v42 = vrot.slane %v1564_v62, 4  ;;  %v840_v12 = vmul.f32 %v2995_v27, %v824_v17  ;;  %v2440_v51 = vpop.eup %2439  ;;  %v971_v45 = vmul.f32 %v955_v13, %v747_v46  ;;  %v3020_v56 = vadd.f32 %v2822_v29, %v563_v57 }
 0x140   : > { %v903_v36 = vmul.f32 %v2956_v58, %v887_v2  ;;  %v841_v7 = vmul.f32 %v2999_v38, %v825_v1  ;;  %v956_v44 = vsub.f32 0.0, %v748_v59  ;;  %v780_v32 = vadd.f32 1.0, %v764_v60 }
 0x141   : > { %v1566_v23 = vadd.f32 %v1565_v42, %v1564_v62  ;;  %v856_v3 = vadd.f32 1.4214138, %v840_v12  ;;  %v997_v50 = vmul.f32 1.442695, %v970_v8  ;;  %v2333_v25 = vpack.c.bf16 %v488_v39, %v487_v15 }
 0x142   : > { %v919_v26 = vadd.f32 0.2548296, %v903_v36  ;;  %v857_v33 = vadd.f32 1.4214138, %v841_v7  ;;  %v2442_v11 = vpop.eup %2441  ;;  %vm1047_vm10 = vcmp.lt.f32.partialorder %v2867_v40, 0.0  ;;  %2449 = vrcp.f32 %v780_v32 }
 0x143   : > { %v1567_v30 = vrot.slane %v1566_v23, 2  ;;  %v872_v48 = vmul.f32 %v2995_v27, %v856_v3  ;;  %v3025_v46 = vadd.f32 %v2828_v35, %v563_v57  ;;  %v3030_v53 = vmul.f32 0.5, %v2959_v22  ;;  %2334 = vmatprep.subr.bf16.mxu0 %v2333_v25 }
 0x144   : > { %v935_v29 = vmul.f32 %v2956_v58, %v919_v26  ;;  %v873_v54 = vmul.f32 %v2999_v38, %v857_v33  ;;  %v3033_v63 = vmul.f32 0.70710677, %v3020_v56  ;;  %v999_v62 = vmul.f32 1.442695, %v971_v45 }
 0x145   : > { %v1568_v5 = vadd.f32 %v1567_v30, %v1566_v23  ;;  %v888_v13 = vadd.f32 -0.28449672, %v872_v48  ;;  %v972_v17 = vmul.f32 %v956_v44, %v748_v59  ;;  %2451 = vpow2.f32 %v997_v50 }
 0x146   : > { %v3035_v2 = vpop.eup %2443  ;;  %v1015_v1 = vmul.f32 %v2440_v51, %v935_v29  ;;  %v889_v35 = vadd.f32 -0.28449672, %v873_v54  ;;  %v749_v58 = vand.u32 2147483647, %v3033_v63  ;;  %v3043_v12 = vmul.f32 0.70710677, %v3025_v46 }
 0x147   : > { %v3038_v8 = vpop.eup %2445  ;;  %v1569_v57 = vrot.slane %v1568_v5, 1  ;;  %v904_v22 = vmul.f32 %v2995_v27, %v888_v13  ;;  %v810_v42 = vmul.f32 1.0614054, %v3035_v2  ;;  %v1001_v23 = vmul.f32 1.442695, %v972_v17 }
 0x148   : > { %v2448_v60 = vpop.eup %2447  ;;  %v1031_v15 = vsub.f32 1.0, %v1015_v1  ;;  %v905_v59 = vmul.f32 %v2999_v38, %v889_v35  ;;  %v811_v39 = vmul.f32 1.0614054, %v3038_v8  ;;  %v765_v51 = vmul.f32 0.3275911, %v749_v58 }
 0x149   : > { %v1570_v36 = vadd.f32 %v1569_v57, %v1568_v5  ;;  %v920_v7 = vadd.f32 0.2548296, %v904_v22  ;;  %v826_v45 = vadd.f32 -1.4531521, %v810_v42  ;;  %vm1048_vm11 = vcmp.lt.f32.partialorder %v2918_v14, 0.0 }
 0x14a   : > { %v1063_v3 = vsub.f32 0.0, %v1031_v15  ;;  %v921_v44 = vadd.f32 0.2548296, %v905_v59  ;;  %v827_v32 = vadd.f32 -1.4531521, %v811_v39  ;;  %v781_v26 = vadd.f32 1.0, %v765_v51 }
 0x14b   : > { %v3048_v33 = vmul.f32 0.03125, %v1570_v36  ;;  %v936_v50 = vmul.f32 %v2995_v27, %v920_v7  ;;  %vm1049_vm12 = vcmp.lt.f32.partialorder %v2922_v16, 0.0  ;;  %v842_v25 = vmul.f32 %v3035_v2, %v826_v45 }
 0x14c   : > { %v750_v30 = vand.u32 2147483647, %v3043_v12  ;;  %v1079_v48 = vsel %vm1047_vm10, %v1063_v3, %v1031_v15  ;;  %v937_v29 = vmul.f32 %v2999_v38, %v921_v44  ;;  %v843_v54 = vmul.f32 %v3038_v8, %v827_v32  ;;  %v3058_v5 = vpop.eup %2449 }
 0x14d   : > { %2453 = vrcp.f32 %v781_v26  ;;  %v3062_v13 = vsub.f32 %v2990_v47, %v3048_v33  ;;  %v3066_v27 = vsub.f32 %v2968_v0, %v3048_v33  ;;  %v1016_v17 = vmul.f32 %v2442_v11, %v936_v50  ;;  %v471_v50 = vld [vmem:[%s3571_s6] sm:$0xff] }
 0x14e   : > { %v957_v1 = vsub.f32 0.0, %v749_v58  ;;  %v1017_v35 = vmul.f32 %v2448_v60, %v937_v29  ;;  %v858_v40 = vadd.f32 1.4214138, %v842_v25  ;;  %v859_v57 = vadd.f32 1.4214138, %v843_v54  ;;  %v489_v29 = vld [vmem:[%s3571_s6 + $0x90] sm:$0xff] }
 0x14f   : > { %v812_v38 = vmul.f32 1.0614054, %v3058_v5  ;;  %v1095_v22 = vadd.f32 1.0, %v1079_v48  ;;  %v1032_v42 = vsub.f32 1.0, %v1016_v17  ;;  %2455 = vpow2.f32 %v999_v62  ;;  %v2452_v59 = vpop.eup %2451  ;;  %v490_v54 = vld [vmem:[%s3571_s6 + $0x98] sm:$0xff] }
 0x150   : > { %v3070_v15 = vmul.f32 0.5, %v2962_v37  ;;  %v1033_v47 = vsub.f32 1.0, %v1017_v35  ;;  %v874_v39 = vmul.f32 %v3035_v2, %v858_v40  ;;  %v875_v0 = vmul.f32 %v3038_v8, %v859_v57  ;;  %v474_v35 = vld [vmem:[%s3571_s6 + $0x18] sm:$0xff] }
 0x151   : > { %v828_v51 = vadd.f32 -1.4531521, %v812_v38  ;;  %v1064_v11 = vsub.f32 0.0, %v1032_v42  ;;  %2457 = vpow2.f32 %v1001_v23  ;;  %v973_v60 = vmul.f32 %v957_v1, %v749_v58  ;;  %v472_v58 = vld [vmem:[%s3571_s6 + $0x8] sm:$0xff] }
 0x152   : > { %v766_v36 = vmul.f32 0.3275911, %v750_v30  ;;  %v1065_v7 = vsub.f32 0.0, %v1033_v47  ;;  %v890_v45 = vadd.f32 -0.28449672, %v874_v39  ;;  %v1578_v37 = vmul.f32 %v3062_v13, %v3062_v13 }
 0x153   : > { %v891_v3 = vadd.f32 -0.28449672, %v875_v0  ;;  %v844_v44 = vmul.f32 %v3058_v5, %v828_v51  ;;  %v1080_v62 = vsel %vm1048_vm11, %v1064_v11, %v1032_v42  ;;  %v958_v26 = vsub.f32 0.0, %v750_v30  ;;  %v491_v11 = vld [vmem:[%s3571_s6 + $0xa0] sm:$0xff] }
 0x154   : > { %v782_v32 = vadd.f32 1.0, %v766_v36  ;;  %v3086_v23 = vmul.f32 %v1095_v22, %v2892_v31  ;;  %v1081_v25 = vsel %vm1049_vm12, %v1065_v7, %v1033_v47  ;;  %v906_v48 = vmul.f32 %v3035_v2, %v890_v45  ;;  %v473_v31 = vld [vmem:[%s3571_s6 + $0x10] sm:$0xff] }
 0x155   : > { %v907_v14 = vmul.f32 %v3038_v8, %v891_v3  ;;  %v1097_v17 = vadd.f32 1.0, %v1081_v25  ;;  %v860_v1 = vadd.f32 1.4214138, %v844_v44  ;;  %v1003_v16 = vmul.f32 1.442695, %v973_v60  ;;  %v492_v60 = vld [vmem:[%s3571_s6 + $0xa8] sm:$0xff] }
 0x156   : > { %2459 = vrcp.f32 %v782_v32  ;;  %v1096_v57 = vadd.f32 1.0, %v1080_v62  ;;  %v922_v38 = vadd.f32 0.2548296, %v906_v48  ;;  %v2335_v42 = vpack.c.bf16 %v472_v58, %v471_v50  ;;  %v475_v3 = vld [vmem:[%s3571_s6 + $0x20] sm:$0xff]  ;;  %v493_v44 = vld [vmem:[%s3571_s6 + $0xb0] sm:$0xff]  ;;  %v494_v50 = vld [vmem:[%s3571_s6 + $0xb8] sm:$0xff] }
 0x157   : > { %v3104_v40 = vpop.eup %2453  ;;  %v923_v22 = vadd.f32 0.2548296, %v907_v14  ;;  %v3107_v47 = vmul.f32 %v1097_v17, %v3006_v4  ;;  %vm1050_vm13 = vcmp.lt.f32.partialorder %v2965_v10, 0.0  ;;  %vm1051_vm14 = vcmp.lt.f32.partialorder %v2973_v34, 0.0  ;;  %v498_v10 = vld [vmem:[%s3571_s6 + $0xd8] sm:$0xff] }
 0x158   : > { %v876_v39 = vmul.f32 %v3058_v5, %v860_v1  ;;  %v813_v0 = vmul.f32 1.0614054, %v3104_v40  ;;  %v974_v51 = vmul.f32 %v958_v26, %v750_v30  ;;  %v938_v4 = vmul.f32 %v3035_v2, %v922_v38  ;;  %2336 = vmatpush3.bf16.msra.mxu0 %v2335_v42  ;;  %v476_v30 = vld [vmem:[%s3571_s6 + $0x28] sm:$0xff]  ;;  %v495_v1 = vld [vmem:[%s3571_s6 + $0xc0] sm:$0xff] }
 0x159   : > { %v939_v36 = vmul.f32 %v3038_v8, %v923_v22  ;;  %v2337_v7 = vpack.c.bf16 %v490_v54, %v489_v29  ;;  %v2339_v45 = vpack.c.bf16 %v474_v35, %v473_v31  ;;  %v2456_v62 = vpop.eup %2455  ;;  %v3131_v2 = vsel %vm1557_vm7, %v1578_v37, 0.0  ;;  %v477_v37 = vld [vmem:[%s3571_s6 + $0x30] sm:$0xff] }
 0x15a   : > { %v3135_v8 = vadd.f32 %v3107_v47, %v3086_v23  ;;  %v892_v32 = vadd.f32 -0.28449672, %v876_v39  ;;  %v829_v26 = vadd.f32 -1.4531521, %v813_v0  ;;  %v1018_v58 = vmul.f32 %v2452_v59, %v938_v4  ;;  %v478_v59 = vld [vmem:[%s3571_s6 + $0x38] sm:$0xff] }
 0x15b   : > { %v1019_v25 = vmul.f32 %v2456_v62, %v939_v36  ;;  %2461 = vpow2.f32 %v1003_v16  ;;  %2338 = vmatprep.subr.bf16.mxu0 %v2337_v7  ;;  %v2341_v48 = vpack.c.bf16 %v492_v60, %v491_v11  ;;  %v2458_v14 = vpop.eup %2457  ;;  %v3144_v29 = vmul.f32 %v1096_v57, %v2980_v9  ;;  %v496_v16 = vld [vmem:[%s3571_s6 + $0xc8] sm:$0xff] }
 0x15c   : > { %v908_v54 = vmul.f32 %v3058_v5, %v892_v32  ;;  %v845_v31 = vmul.f32 %v3104_v40, %v829_v26  ;;  %v1005_v17 = vmul.f32 1.442695, %v974_v51  ;;  %v1034_v35 = vsub.f32 1.0, %v1018_v58  ;;  %2340 = vmatpush3.bf16.msra.mxu0 %v2339_v45 }
 0x15d   : > { %v1035_v9 = vsub.f32 1.0, %v1019_v25  ;;  %v2343_v57 = vpack.c.bf16 %v476_v30, %v475_v3  ;;  %v2345_v38 = vpack.c.bf16 %v494_v50, %v493_v44  ;;  %2342 = vmatprep.subr.bf16.mxu0 %v2341_v48  ;;  %v3159_v39 = vsub.f32 %v2940_v20, %v3048_v33  ;;  %v479_v3 = vld [vmem:[%s3571_s6 + $0x40] sm:$0xff]  ;;  %v480_v20 = vld [vmem:[%s3571_s6 + $0x48] sm:$0xff]  ;;  %v497_v25 = vld [vmem:[%s3571_s6 + $0xd0] sm:$0xff] }
 0x15e   : > { %v924_v22 = vadd.f32 0.2548296, %v908_v54  ;;  %v861_v42 = vadd.f32 1.4214138, %v845_v31  ;;  %v3163_v0 = vsub.f32 %v2934_v24, %v3048_v33  ;;  %v1066_v51 = vsub.f32 0.0, %v1034_v35 }
 0x15f   : > { %v1067_v11 = vsub.f32 0.0, %v1035_v9  ;;  %v2347_v60 = vpack.c.bf16 %v478_v59, %v477_v37  ;;  %v2349_v4 = vpack.c.bf16 %v496_v16, %v495_v1  ;;  %v1576_v24 = vmul.f32 %v3159_v39, %v3159_v39 }
 0x160   : > { %v3165_v36 = vpop.eup %2459  ;;  %v940_v7 = vmul.f32 %v3058_v5, %v924_v22  ;;  %v877_v45 = vmul.f32 %v3104_v40, %v861_v42  ;;  %v1577_v33 = vmul.f32 %v3163_v0, %v3163_v0  ;;  %v1082_v30 = vsel %vm1050_vm13, %v1066_v51, %v1034_v35  ;;  %2344 = vmatpush3.bf16.msra.mxu0 %v2343_v57  ;;  %v481_v51 = vld [vmem:[%s3571_s6 + $0x50] sm:$0xff] }
 0x161   : > { %v1083_v5 = vsel %vm1051_vm14, %v1067_v11, %v1035_v9  ;;  %v814_v44 = vmul.f32 1.0614054, %v3165_v36  ;;  %v1579_v62 = vmul.f32 %v3066_v27, %v3066_v27  ;;  %v1098_v32 = vadd.f32 1.0, %v1082_v30  ;;  %2346 = vmatprep.subr.bf16.mxu0 %v2345_v38  ;;  %v482_v11 = vld [vmem:[%s3571_s6 + $0x58] sm:$0xff] }
 0x162   : > { %v1099_v26 = vadd.f32 1.0, %v1083_v5  ;;  %v1020_v50 = vmul.f32 %v2458_v14, %v940_v7  ;;  %v893_v58 = vadd.f32 -0.28449672, %v877_v45  ;;  %v2351_v48 = vpack.c.bf16 %v480_v20, %v479_v3 }
 0x163   : > { %v830_v34 = vadd.f32 -1.4531521, %v814_v44  ;;  %v1580_v37 = vsel %vm1557_vm7, %v1576_v24, 0.0  ;;  %v1581_v54 = vsel %vm1557_vm7, %v1577_v33, 0.0  ;;  %v3195_v31 = vmul.f32 %v1098_v32, %v3009_v18  ;;  %v501_v44 = vld [vmem:[%s3571_s6 + $0xf0] sm:$0xff] }
 0x164   : > { %v3198_v14 = vmul.f32 %v1099_v26, %v3030_v53  ;;  %v1036_v59 = vsub.f32 1.0, %v1020_v50  ;;  %v909_v1 = vmul.f32 %v3104_v40, %v893_v58  ;;  %2348 = vmatpush3.bf16.msra.mxu0 %v2347_v60  ;;  %v1582_v9 = vadd.f32 %v1581_v54, %v1580_v37 }
 0x165   : > { %v2462_v16 = vpop.eup %2461  ;;  %v846_v35 = vmul.f32 %v3165_v36, %v830_v34  ;;  %v1585_v57 = vsel %vm1557_vm7, %v1579_v62, 0.0  ;;  %v2353_v38 = vpack.c.bf16 %v498_v10, %v497_v25  ;;  %v1441_v22 = vadd.f32 %v3195_v31, %v3144_v29  ;;  %2350 = vmatprep.subr.bf16.mxu0 %v2349_v4  ;;  %v500_v4 = vld [vmem:[%s3571_s6 + $0xe8] sm:$0xff]  ;;  %v502_v62 = vld [vmem:[%s3571_s6 + $0xf8] sm:$0xff]  ;;  %v485_v34 = vld [vmem:[%s3571_s6 + $0x70] sm:$0xff] }
 0x166   : > { %v1433_v18 = vadd.f32 %v3135_v8, %v3198_v14  ;;  %v1068_v42 = vsub.f32 0.0, %v1036_v59  ;;  %v925_v53 = vadd.f32 0.2548296, %v909_v1  ;;  %vm1052_vm15 = vcmp.lt.f32.partialorder %v2984_v6, 0.0  ;;  %v499_v8 = vld [vmem:[%s3571_s6 + $0xe0] sm:$0xff] }
 0x167   : > { %v862_v60 = vadd.f32 1.4214138, %v846_v35  ;;  %2463 = vpow2.f32 %v1005_v17  ;;  %v1584_v7 = vadd.f32 %v3131_v2, %v1582_v9  ;;  %v3224_v20 = vpack.c.bf16 %v2949_v21, %v2952_v55  ;;  %v484_v21 = vld [vmem:[%s3571_s6 + $0x68] sm:$0xff] }
 0x168   : > { %v1084_v45 = vsel %vm1052_vm15, %v1068_v42, %v1036_v59  ;;  %v941_v3 = vmul.f32 %v3104_v40, %v925_v53  ;;  %v3228_v6 = vpack.c.bf16 %v2977_v28, %v2987_v19  ;;  %2352 = vmatpush3.bf16.msra.mxu0 %v2351_v48  ;;  %v2355_v33 = vpack.c.bf16 %v482_v11, %v481_v51  ;;  %v483_v40 = vld [vmem:[%s3571_s6 + $0x60] sm:$0xff]  ;;  %v486_v48 = vld [vmem:[%s3571_s6 + $0x78] sm:$0xff] }
 0x169   : > { %v1100_v2 = vadd.f32 1.0, %v1084_v45  ;;  %v878_v17 = vmul.f32 %v3165_v36, %v862_v60  ;;  %v1586_v24 = vadd.f32 %v1585_v57, %v1584_v7  ;;  %2354 = vmatprep.subr.bf16.mxu0 %v2353_v38  ;;  %v2357_v5 = vpack.c.bf16 %v500_v4, %v499_v8 }
 0x16a   : > { %v1021_v30 = vmul.f32 %v2462_v16, %v941_v3  ;;  %v2359_v25 = vpack.c.bf16 %v484_v21, %v483_v40  ;;  %v2361_v10 = vpack.c.bf16 %v502_v62, %v501_v44  ;;  %vm1053_vm1 = vcmp.lt.f32.partialorder %v3033_v63, 0.0 }
 0x16b   : > { %v3238_v55 = vmul.f32 %v1100_v2, %v3070_v15  ;;  %v894_v28 = vadd.f32 -0.28449672, %v878_v17  ;;  %v1587_v19 = vrot.slane %v1586_v24, 4  ;;  %v717_v59 = vmul.f32 0.5, %v3020_v56 }
 0x16c   : > { %v1037_v32 = vsub.f32 1.0, %v1021_v30  ;;  %2356 = vmatpush3.bf16.msra.mxu0 %v2355_v33  ;;  %v2363_v38 = vpack.c.bf16 %v486_v48, %v485_v34  ;;  %vm1054_vm2 = vcmp.lt.f32.partialorder %v3043_v12, 0.0 }
 0x16d   : > { %v1442_v26 = vadd.f32 %v1441_v22, %v3238_v55  ;;  %v910_v50 = vmul.f32 %v3165_v36, %v894_v28  ;;  %v1588_v58 = vadd.f32 %v1587_v19, %v1586_v24  ;;  %2358 = vmatprep.subr.bf16.mxu0 %v2357_v5 }
 0x16e   : > { %v1069_v15 = vsub.f32 0.0, %v1037_v32 }
 0x16f   : > { %v926_v37 = vadd.f32 0.2548296, %v910_v50  ;;  %v1589_v54 = vrot.slane %v1588_v58, 2 }
 0x170   : > { %v1085_v1 = vsel %vm1053_vm1, %v1069_v15, %v1037_v32  ;;  %2360 = vmatpush3.bf16.msra.mxu0 %v2359_v25 }
 0x171   : > { %v2464_v16 = vpop.eup %2463  ;;  %v1101_v35 = vadd.f32 1.0, %v1085_v1  ;;  %v942_v9 = vmul.f32 %v3165_v36, %v926_v37  ;;  %v1590_v57 = vadd.f32 %v1589_v54, %v1588_v58  ;;  %2362 = vmatprep.subr.bf16.mxu0 %v2361_v10  ;;  %v718_v36 = vmul.f32 0.5, %v3025_v46 }
 0x173   : > { %v1117_v22 = vmul.f32 %v1101_v35, %v717_v59  ;;  %v1022_v42 = vmul.f32 %v2464_v16, %v942_v9  ;;  %v1591_v53 = vrot.slane %v1590_v57, 1  ;;  %v2506_v59 = vld [vmem:[%s3570_s5 + $0x8] sm:$0xff]  ;;  %v2507_v16 = vld [vmem:[%s3570_s5] sm:$0xff] }
 0x174   : > { %2364 = vmatpush3.bf16.msra.mxu0 %v2363_v38  ;;  %v2508_v38 = vld [vmem:[%s3569_s4 + $0x10] sm:$0xff] }
 0x175   : > { %v1434_v51 = vadd.f32 %v1433_v18, %v1117_v22  ;;  %v1038_v11 = vsub.f32 1.0, %v1022_v42  ;;  %v1592_v60 = vadd.f32 %v1591_v53, %v1590_v57  ;;  %v2509_v42 = vld [vmem:[%s3570_s5 + $0x18] sm:$0xff] }
 0x177   : > { %v1435_v63 = vrot.slane %v1434_v51, 4  ;;  %v1070_v7 = vsub.f32 0.0, %v1038_v11  ;;  %v1593_v8 = vmul.f32 0.03125, %v1592_v60 }
 0x179   : > { %v1436_v56 = vadd.f32 %v1435_v63, %v1434_v51  ;;  %v1086_v4 = vsel %vm1054_vm2, %v1070_v7, %v1038_v11  ;;  %v1594_v45 = vadd.f32 1e-05, %v1593_v8  ;;  %v2510_v11 = vld [vmem:[%s3570_s5 + $0x10] sm:$0xff] }
 0x17a   : > { %v1102_v3 = vadd.f32 1.0, %v1086_v4 }
 0x17b   : > { %v1437_v2 = vrot.slane %v1436_v56, 2  ;;  %2465 = vrsqrt.f32 %v1594_v45 }
 0x17c   : > { %v1118_v17 = vmul.f32 %v1102_v3, %v718_v36 }
 0x17d   : > { %v1438_v24 = vadd.f32 %v1437_v2, %v1436_v56 }
 0x17e   : > { %v1443_v33 = vadd.f32 %v1442_v26, %v1118_v17 }
 0x17f   : > { %v1439_v18 = vrot.slane %v1438_v24, 1 }
 0x180   : > { %v1444_v30 = vrot.slane %v1443_v33, 4 }
 0x181   : > { %v1440_v5 = vadd.f32 %v1439_v18, %v1438_v24 }
 0x182   : > { %v1445_v40 = vadd.f32 %v1444_v30, %v1443_v33 }
 0x183   : > { %v1451_v21 = vmul.f32 0.03125, %v1440_v5 }
 0x184   : > { %v1446_v28 = vrot.slane %v1445_v40, 2 }
 0x185   : > { %v2466_v19 = vpop.eup %2465  ;;  %v3260_v12 = vsub.f32 %v3086_v23, %v1451_v21  ;;  %v3263_v44 = vsub.f32 %v3107_v47, %v1451_v21  ;;  %v3266_v46 = vsub.f32 %v3198_v14, %v1451_v21  ;;  %v3268_v62 = vsub.f32 %v1117_v22, %v1451_v21  ;;  %v2503_v14 = vld [vmem:[%s3569_s4 + $0x8] sm:$0xff]  ;;  %v2514_v21 = vld [vmem:[%s3568_s3 + $0x18] sm:$0xff] }
 0x186   : > { %v1447_v32 = vadd.f32 %v1446_v28, %v1445_v40  ;;  %v1597_v26 = vmul.f32 %v2466_v19, %v3163_v0  ;;  %v1596_v50 = vmul.f32 %v2466_v19, %v3159_v39  ;;  %v1599_v58 = vmul.f32 %v2466_v19, %v3066_v27  ;;  %v2504_v0 = vld [vmem:[%s3569_s4] sm:$0xff]  ;;  %v2505_v27 = vld [vmem:[%s3569_s4 + $0x18] sm:$0xff]  ;;  %v2513_v40 = vld [vmem:[%s3568_s3 + $0x10] sm:$0xff] }
 0x187   : > { %v1461_v25 = vmul.f32 %v3260_v12, %v3260_v12  ;;  %v1463_v23 = vmul.f32 %v3263_v44, %v3263_v44  ;;  %v1465_v34 = vmul.f32 %v3266_v46, %v3266_v46  ;;  %v1598_v37 = vmul.f32 %v2466_v19, %v3062_v13 }
 0x188   : > { %v1448_v47 = vrot.slane %v1447_v32, 1  ;;  %v1601_v15 = vmul.f32 %v2503_v14, %v1597_v26  ;;  %v1600_v10 = vmul.f32 %v2504_v0, %v1596_v50  ;;  %v1603_v39 = vmul.f32 %v2505_v27, %v1599_v58  ;;  %v3329_v26 = vld [vmem:[%s3575_s10 + $0x8] sm:$0xff]  ;;  %v3341_v14 = vld [vmem:[%s3575_s10] sm:$0xff] }
 0x189   : > { %v1469_v48 = vadd.f32 %v1463_v23, %v1461_v25  ;;  %v1467_v9 = vmul.f32 %v3268_v62, %v3268_v62  ;;  %v1602_v13 = vmul.f32 %v2508_v38, %v1598_v37 }
 0x18a   : > { %v1449_v54 = vadd.f32 %v1448_v47, %v1447_v32  ;;  %v1605_v1 = vadd.f32 %v2506_v59, %v1601_v15  ;;  %v1604_v35 = vadd.f32 %v2507_v16, %v1600_v10  ;;  %v1607_v53 = vadd.f32 %v2509_v42, %v1603_v39  ;;  %v3324_v32 = vld [vmem:[%s3575_s10 + $0x18] sm:$0xff]  ;;  %v3336_v47 = vld [vmem:[%s3575_s10 + $0x10] sm:$0xff]  ;;  %v1532_v16 = vpop.permute.xlu1 %1531 }
 0x18b   : > { %v1470_v57 = vadd.f32 %v1469_v48, %v1465_v34  ;;  %v1606_v60 = vadd.f32 %v2510_v11, %v1602_v13  ;;  %v1504_v48 = vpop.permute.xlu0 %1503 }
 0x18c   : > { %v1452_v22 = vmul.f32 0.03125, %v1449_v54  ;;  %1615 = vperm.xlu1 %2400, %v1605_v1   ;;  %1610 = vperm.xlu0 %2399, %v1604_v35  }
 0x18d   : > { %v1471_v51 = vadd.f32 %v1470_v57, %v1467_v9 }
 0x18e   : > { %v1460_v63 = vsub.f32 %v1118_v17, %v1452_v22  ;;  %v1454_v7 = vsub.f32 %v3144_v29, %v1452_v22  ;;  %v1456_v8 = vsub.f32 %v3195_v31, %v1452_v22  ;;  %v1458_v56 = vsub.f32 %v3238_v55, %v1452_v22  ;;  %v2511_v17 = vld [vmem:[%s3568_s3] sm:$0xff]  ;;  %v2512_v29 = vld [vmem:[%s3568_s3 + $0x8] sm:$0xff]  ;;  %v1537_v42 = vpop.permute.xlu1 %1536 }
 0x18f   : > { %v1472_v4 = vrot.slane %v1471_v51, 4  ;;  %v1509_v35 = vpop.permute.xlu0 %1508 }
 0x190   : > { %1625 = vperm.xlu1 %2400, %v1607_v53   ;;  %1620 = vperm.xlu0 %2399, %v1606_v60   ;;  %v1462_v45 = vmul.f32 %v1454_v7, %v1454_v7  ;;  %v1464_v36 = vmul.f32 %v1456_v8, %v1456_v8  ;;  %v1466_v2 = vmul.f32 %v1458_v56, %v1458_v56 }
 0x191   : > { %v1473_v3 = vadd.f32 %v1472_v4, %v1471_v51  ;;  %v1468_v18 = vmul.f32 %v1460_v63, %v1460_v63 }
 0x192   : > { %v1478_v24 = vadd.f32 %v1464_v36, %v1462_v45  ;;  %v1542_v36 = vpop.permute.xlu1 %1541 }
 0x193   : > { %v1474_v33 = vrot.slane %v1473_v3, 2  ;;  %v1514_v60 = vpop.permute.xlu0 %1513 }
 0x194   : > { %527 = vperm.xlu1 %2400, %v2511_v17   ;;  %532 = vperm.xlu0 %2399, %v2512_v29   ;;  %v1479_v31 = vadd.f32 %v1478_v24, %v1466_v2 }
 0x195   : > { %v1475_v55 = vadd.f32 %v1474_v33, %v1473_v3 }
 0x196   : > { %v1480_v30 = vadd.f32 %v1479_v31, %v1468_v18 }
 0x197   : > { %v1476_v5 = vrot.slane %v1475_v55, 1 }
 0x198   : > { %537 = vperm.xlu1 %2400, %v2513_v40   ;;  %542 = vperm.xlu0 %2399, %v2514_v21   ;;  %v1481_v28 = vrot.slane %v1480_v30, 4 }
 0x199   : > { %v1477_v19 = vadd.f32 %v1476_v5, %v1475_v55 }
 0x19a   : > { %v1482_v50 = vadd.f32 %v1481_v28, %v1480_v30 }
 0x19b   : > { %v1487_v58 = vmul.f32 0.03125, %v1477_v19 }
 0x19c   : > { %v1483_v25 = vrot.slane %v1482_v50, 2  ;;  %1847 = vperm.xlu1 %2400, %v3324_v32   ;;  %1837 = vperm.xlu0 %2399, %v3329_v26  }
 0x19d   : > { %v1489_v23 = vadd.f32 1e-05, %v1487_v58 }
 0x19e   : > { %v1484_v15 = vadd.f32 %v1483_v25, %v1482_v50 }
 0x19f   : > { %2467 = vrsqrt.f32 %v1489_v23 }
 0x1a0   : > { %v1485_v0 = vrot.slane %v1484_v15, 1  ;;  %1842 = vperm.xlu1 %2400, %v3336_v47   ;;  %1832 = vperm.xlu0 %2399, %v3341_v14  }
 0x1a2   : > { %v1486_v10 = vadd.f32 %v1485_v0, %v1484_v15 }
 0x1a4   : > { %v1488_v27 = vmul.f32 0.03125, %v1486_v10 }
 0x1a6   : > { %v1490_v39 = vadd.f32 1e-05, %v1488_v27 }
 0x1a8   : > { %2469 = vrsqrt.f32 %v1490_v39 }
 0x1a9   : > { %v2468_v34 = vpop.eup %2467 }
 0x1aa   : > { %v1493_v37 = vmul.f32 %v2468_v34, %v3260_v12  ;;  %v1495_v54 = vmul.f32 %v2468_v34, %v3263_v44  ;;  %v1497_v59 = vmul.f32 %v2468_v34, %v3266_v46  ;;  %v1499_v1 = vmul.f32 %v2468_v34, %v3268_v62  ;;  %v1519_v62 = vpop.permute.xlu0 %1518 }
 0x1ac   : > { %v1521_v53 = vmul.f32 %v1504_v48, %v1493_v37  ;;  %v1523_v45 = vmul.f32 %v1509_v35, %v1495_v54  ;;  %v1527_v24 = vmul.f32 %v1519_v62, %v1499_v1 }
 0x1ae   : > { %v1549_v12 = vadd.f32 %v1532_v16, %v1521_v53  ;;  %v1551_v3 = vadd.f32 %v1537_v42, %v1523_v45 }
 0x1b2   : > { %v2470_v9 = vpop.eup %2469 }
 0x1b3   : > { %v1494_v57 = vmul.f32 %v2470_v9, %v1454_v7  ;;  %v1496_v38 = vmul.f32 %v2470_v9, %v1456_v8  ;;  %v1498_v13 = vmul.f32 %v2470_v9, %v1458_v56  ;;  %v1500_v22 = vmul.f32 %v2470_v9, %v1460_v63  ;;  %v1547_v63 = vpop.permute.xlu1 %1546 }
 0x1b4   : > { %v1525_v7 = vmul.f32 %v1514_v60, %v1497_v59  ;;  %v1555_v18 = vadd.f32 %v1547_v63, %v1527_v24 }
 0x1b5   : > { %v1522_v51 = vmul.f32 %v1504_v48, %v1494_v57  ;;  %v1524_v11 = vmul.f32 %v1509_v35, %v1496_v38  ;;  %v1526_v46 = vmul.f32 %v1514_v60, %v1498_v13  ;;  %v1528_v56 = vmul.f32 %v1519_v62, %v1500_v22  ;;  %v3584_v57 = vld [vmem:[#allocation3_spill] sm:$0xff] }
 0x1b6   : > { %v1553_v2 = vadd.f32 %v1542_v36, %v1525_v7 }
 0x1b7   : > { %v1550_v4 = vadd.f32 %v1532_v16, %v1522_v51  ;;  %v1552_v44 = vadd.f32 %v1537_v42, %v1524_v11  ;;  %v1554_v8 = vadd.f32 %v1542_v36, %v1526_v46  ;;  %v1556_v33 = vadd.f32 %v1547_v63, %v1528_v56  ;;  %v3583_v16 = vld [vmem:[#allocation2_spill] sm:$0xff]  ;;  %v3585_v42 = vld [vmem:[#allocation4_spill] sm:$0xff] }
 0x1b9   : > { %1702 = vmatprep.mubr.f32.mxu0 %v1550_v4 }
 0x1ba   : > { %1703 = vmatmul.mubr.f32.vlgmr.msra.gmra.mrb[16].mxu0 %v1549_v12 }
 0x1bb   : > { %1707 = vmatprep.mubr.f32.mxu0 %v1552_v44 }
 0x1be   : > { %1708 = vmatmul.mubr.f32.gmra.mrb[18].mxu0 %v1551_v3 }
 0x1bf   : > { %1712 = vmatprep.mubr.f32.mxu0 %v1554_v8  ;;  %v505_v8 = vld [vmem:[%s3574_s9] sm:$0xff] }
 0x1c0   : > { %2297 = vmatprep.mubr.msk.f32.mxu1 %vm565_vm0, %v505_v8 }
 0x1c2   : > { %1713 = vmatmul.mubr.f32.gmra.mrb[20].mxu0 %v1553_v2 }
 0x1c3   : > { %1717 = vmatprep.mubr.f32.mxu0 %v1556_v33 }
 0x1c6   : > { %1718 = vmatmul.mubr.f32.gmra.mrb[22].mxu0 %v1555_v18 }
 0x20b   : > { %v3349_v17 = vpop.permute.xlu1 %1615  ;;  %v3351_v29 = vpop.permute.xlu0 %1610 }
 0x20f   : > { %v3353_v31 = vpop.permute.xlu1 %1625  ;;  %v3355_v55 = vpop.permute.xlu0 %1620 }
 0x213   : > { %v528_v30 = vpop.permute.xlu1 %527  ;;  %v533_v5 = vpop.permute.xlu0 %532 }
 0x214   : > { %v657_v40 = vadd.f32 %v2711_v41, %v528_v30  ;;  %v659_v21 = vadd.f32 %v2716_v43, %v528_v30  ;;  %v663_v28 = vadd.f32 %v2725_v49, %v533_v5  ;;  %v665_v19 = vadd.f32 %v2733_v52, %v533_v5 }
 0x216   : > { %v3361_v50 = vmul.f32 0.70710677, %v657_v40  ;;  %v3363_v58 = vmul.f32 0.70710677, %v659_v21  ;;  %v3365_v25 = vmul.f32 0.70710677, %v663_v28 }
 0x217   : > { %v3367_v23 = vmul.f32 0.70710677, %v665_v19  ;;  %v538_v39 = vpop.permute.xlu1 %537  ;;  %v543_v37 = vpop.permute.xlu0 %542  ;;  %v3385_v13 = vmul.f32 0.5, %v657_v40  ;;  %v3394_v60 = vmul.f32 0.5, %v659_v21  ;;  %v3397_v45 = vmul.f32 0.5, %v663_v28 }
 0x218   : > { %v735_v15 = vand.u32 2147483647, %v3361_v50  ;;  %v736_v0 = vand.u32 2147483647, %v3363_v58  ;;  %v737_v41 = vand.u32 2147483647, %v3365_v25  ;;  %v3374_v59 = vadd.f32 %v2744_v61, %v538_v39 }
 0x219   : > { %v738_v43 = vand.u32 2147483647, %v3367_v23  ;;  %v3377_v35 = vadd.f32 %v3583_v16, %v538_v39  ;;  %v3383_v38 = vadd.f32 %v3584_v57, %v543_v37  ;;  %v3391_v53 = vadd.f32 %v3585_v42, %v543_v37 }
 0x21a   : > { %v751_v10 = vmul.f32 0.3275911, %v735_v15  ;;  %v752_v49 = vmul.f32 0.3275911, %v736_v0  ;;  %v753_v27 = vmul.f32 0.3275911, %v737_v41 }
 0x21b   : > { %v754_v52 = vmul.f32 0.3275911, %v738_v43  ;;  %v3380_v9 = vmul.f32 0.70710677, %v3374_v59  ;;  %v3388_v22 = vmul.f32 0.70710677, %v3377_v35 }
 0x21c   : > { %v767_v34 = vadd.f32 1.0, %v751_v10  ;;  %v768_v48 = vadd.f32 1.0, %v752_v49  ;;  %v769_v54 = vadd.f32 1.0, %v753_v27  ;;  %v943_v61 = vsub.f32 0.0, %v735_v15 }
 0x21d   : > { %v770_v1 = vadd.f32 1.0, %v754_v52  ;;  %v944_v51 = vsub.f32 0.0, %v736_v0  ;;  %v739_v11 = vand.u32 2147483647, %v3380_v9  ;;  %v945_v4 = vsub.f32 0.0, %v737_v41 }
 0x21e   : > { %2471 = vrcp.f32 %v767_v34  ;;  %v740_v12 = vand.u32 2147483647, %v3388_v22  ;;  %v946_v44 = vsub.f32 0.0, %v738_v43  ;;  %v3400_v36 = vmul.f32 0.70710677, %v3383_v38 }
 0x21f   : > { %2473 = vrcp.f32 %v768_v48  ;;  %v755_v46 = vmul.f32 0.3275911, %v739_v11  ;;  %v3402_v62 = vmul.f32 0.5, %v665_v19  ;;  %v3405_v7 = vmul.f32 0.70710677, %v3391_v53 }
 0x220   : > { %2475 = vrcp.f32 %v769_v54  ;;  %v756_v3 = vmul.f32 0.3275911, %v740_v12  ;;  %v959_v56 = vmul.f32 %v943_v61, %v735_v15  ;;  %v960_v63 = vmul.f32 %v944_v51, %v736_v0 }
 0x221   : > { %2477 = vrcp.f32 %v770_v1  ;;  %v771_v2 = vadd.f32 1.0, %v755_v46  ;;  %v741_v24 = vand.u32 2147483647, %v3400_v36  ;;  %v961_v33 = vmul.f32 %v945_v4, %v737_v41 }
 0x222   : > { %v947_v18 = vsub.f32 0.0, %v739_v11  ;;  %v772_v30 = vadd.f32 1.0, %v756_v3  ;;  %v742_v5 = vand.u32 2147483647, %v3405_v7  ;;  %v962_v21 = vmul.f32 %v946_v44, %v738_v43 }
 0x223   : > { %2479 = vrcp.f32 %v771_v2  ;;  %v948_v28 = vsub.f32 0.0, %v740_v12  ;;  %v757_v19 = vmul.f32 0.3275911, %v741_v24  ;;  %v949_v49 = vsub.f32 0.0, %v741_v24 }
 0x224   : > { %2481 = vrcp.f32 %v772_v30  ;;  %v758_v0 = vmul.f32 0.3275911, %v742_v5  ;;  %v975_v27 = vmul.f32 1.442695, %v959_v56  ;;  %v950_v39 = vsub.f32 0.0, %v742_v5 }
 0x225   : > { %v773_v52 = vadd.f32 1.0, %v757_v19  ;;  %v977_v48 = vmul.f32 1.442695, %v960_v63  ;;  %v963_v37 = vmul.f32 %v947_v18, %v739_v11  ;;  %v979_v16 = vmul.f32 1.442695, %v961_v33 }
 0x226   : > { %v774_v54 = vadd.f32 1.0, %v758_v0  ;;  %v964_v57 = vmul.f32 %v948_v28, %v740_v12  ;;  %v965_v4 = vmul.f32 %v949_v49, %v741_v24  ;;  %v981_v11 = vmul.f32 1.442695, %v962_v21 }
 0x227   : > { %2483 = vrcp.f32 %v773_v52  ;;  %v966_v3 = vmul.f32 %v950_v39, %v742_v5  ;;  %v983_v63 = vmul.f32 1.442695, %v963_v37  ;;  %vm1039_vm3 = vcmp.lt.f32.partialorder %v3361_v50, 0.0 }
 0x228   : > { %v3413_v40 = vpop.eup %2471  ;;  %2485 = vrcp.f32 %v774_v54  ;;  %v985_v33 = vmul.f32 1.442695, %v964_v57  ;;  %v987_v24 = vmul.f32 1.442695, %v965_v4  ;;  %vm1040_vm4 = vcmp.lt.f32.partialorder %v3363_v58, 0.0 }
 0x229   : > { %v3415_v10 = vpop.eup %2473  ;;  %v799_v15 = vmul.f32 1.0614054, %v3413_v40  ;;  %2487 = vpow2.f32 %v975_v27  ;;  %v989_v21 = vmul.f32 1.442695, %v966_v3  ;;  %vm1041_vm5 = vcmp.lt.f32.partialorder %v3365_v25, 0.0 }
 0x22a   : > { %v800_v41 = vmul.f32 1.0614054, %v3415_v10  ;;  %v3419_v43 = vpop.eup %2475  ;;  %2489 = vpow2.f32 %v977_v48  ;;  %vm1042_vm6 = vcmp.lt.f32.partialorder %v3367_v23, 0.0  ;;  %vm1043_vm8 = vcmp.lt.f32.partialorder %v3380_v9, 0.0 }
 0x22b   : > { %v815_v34 = vadd.f32 -1.4531521, %v799_v15  ;;  %v3421_v42 = vpop.eup %2477  ;;  %v801_v51 = vmul.f32 1.0614054, %v3419_v43  ;;  %2491 = vpow2.f32 %v979_v16  ;;  %vm1044_vm9 = vcmp.lt.f32.partialorder %v3388_v22, 0.0 }
 0x22c   : > { %v816_v1 = vadd.f32 -1.4531521, %v800_v41  ;;  %v802_v46 = vmul.f32 1.0614054, %v3421_v42  ;;  %2493 = vpow2.f32 %v981_v11  ;;  %v707_v9 = vmul.f32 0.5, %v3374_v59 }
 0x22d   : > { %v831_v61 = vmul.f32 %v3413_v40, %v815_v34  ;;  %v817_v56 = vadd.f32 -1.4531521, %v801_v51  ;;  %v3429_v28 = vpop.eup %2479  ;;  %2495 = vpow2.f32 %v983_v63  ;;  %vm1045_vm10 = vcmp.lt.f32.partialorder %v3400_v36, 0.0 }
 0x22e   : > { %v832_v44 = vmul.f32 %v3415_v10, %v816_v1  ;;  %v818_v2 = vadd.f32 -1.4531521, %v802_v46  ;;  %v3433_v15 = vpop.eup %2481  ;;  %v803_v27 = vmul.f32 1.0614054, %v3429_v28  ;;  %2497 = vpow2.f32 %v985_v33 }
 0x22f   : > { %v847_v8 = vadd.f32 1.4214138, %v831_v61  ;;  %v833_v30 = vmul.f32 %v3419_v43, %v817_v56  ;;  %v804_v39 = vmul.f32 1.0614054, %v3433_v15  ;;  %2499 = vpow2.f32 %v987_v24 }
 0x230   : > { %v848_v12 = vadd.f32 1.4214138, %v832_v44  ;;  %v834_v5 = vmul.f32 %v3421_v42, %v818_v2  ;;  %v819_v37 = vadd.f32 -1.4531521, %v803_v27  ;;  %2501 = vpow2.f32 %v989_v21 }
 0x231   : > { %v863_v18 = vmul.f32 %v3413_v40, %v847_v8  ;;  %v849_v49 = vadd.f32 1.4214138, %v833_v30  ;;  %v3439_v54 = vpop.eup %2483  ;;  %v820_v57 = vadd.f32 -1.4531521, %v804_v39  ;;  %vm1046_vm11 = vcmp.lt.f32.partialorder %v3405_v7, 0.0 }
 0x232   : > { %v864_v19 = vmul.f32 %v3415_v10, %v848_v12  ;;  %v850_v52 = vadd.f32 1.4214138, %v834_v5  ;;  %v3443_v61 = vpop.eup %2485  ;;  %v835_v44 = vmul.f32 %v3429_v28, %v819_v37  ;;  %v805_v46 = vmul.f32 1.0614054, %v3439_v54 }
 0x233   : > { %v879_v0 = vadd.f32 -0.28449672, %v863_v18  ;;  %v865_v48 = vmul.f32 %v3419_v43, %v849_v49  ;;  %v836_v8 = vmul.f32 %v3433_v15, %v820_v57  ;;  %v806_v56 = vmul.f32 1.0614054, %v3443_v61  ;;  %v2488_v63 = vpop.eup %2487 }
 0x234   : > { %v880_v41 = vadd.f32 -0.28449672, %v864_v19  ;;  %v866_v16 = vmul.f32 %v3421_v42, %v850_v52  ;;  %v851_v33 = vadd.f32 1.4214138, %v835_v44  ;;  %v821_v18 = vadd.f32 -1.4531521, %v805_v46  ;;  %v2490_v30 = vpop.eup %2489 }
 0x235   : > { %v895_v34 = vmul.f32 %v3413_v40, %v879_v0  ;;  %v881_v4 = vadd.f32 -0.28449672, %v865_v48  ;;  %v852_v5 = vadd.f32 1.4214138, %v836_v8  ;;  %v822_v21 = vadd.f32 -1.4531521, %v806_v56  ;;  %v2492_v0 = vpop.eup %2491 }
 0x236   : > { %v896_v1 = vmul.f32 %v3415_v10, %v880_v41  ;;  %v882_v3 = vadd.f32 -0.28449672, %v866_v16  ;;  %v867_v41 = vmul.f32 %v3429_v28, %v851_v33  ;;  %v2494_v52 = vpop.eup %2493 }
 0x237   : > { %v911_v51 = vadd.f32 0.2548296, %v895_v34  ;;  %v897_v2 = vmul.f32 %v3419_v43, %v881_v4  ;;  %v868_v48 = vmul.f32 %v3433_v15, %v852_v5  ;;  %v2496_v37 = vpop.eup %2495 }
 0x238   : > { %v912_v11 = vadd.f32 0.2548296, %v896_v1  ;;  %v898_v19 = vmul.f32 %v3421_v42, %v882_v3  ;;  %v883_v57 = vadd.f32 -0.28449672, %v867_v41  ;;  %v2498_v4 = vpop.eup %2497 }
 0x239   : > { %v927_v12 = vmul.f32 %v3413_v40, %v911_v51  ;;  %v913_v27 = vadd.f32 0.2548296, %v897_v2  ;;  %v837_v40 = vmul.f32 %v3439_v54, %v821_v18  ;;  %v2500_v8 = vpop.eup %2499 }
 0x23a   : > { %v928_v24 = vmul.f32 %v3415_v10, %v912_v11  ;;  %v914_v34 = vadd.f32 0.2548296, %v898_v19  ;;  %v838_v10 = vmul.f32 %v3443_v61, %v822_v21  ;;  %v884_v11 = vadd.f32 -0.28449672, %v868_v48  ;;  %v2502_v33 = vpop.eup %2501 }
 0x23b   : > { %v1007_v49 = vmul.f32 %v2488_v63, %v927_v12  ;;  %v929_v16 = vmul.f32 %v3419_v43, %v913_v27  ;;  %v853_v51 = vadd.f32 1.4214138, %v837_v40  ;;  %v899_v12 = vmul.f32 %v3429_v28, %v883_v57 }
 0x23c   : > { %v1008_v39 = vmul.f32 %v2490_v30, %v928_v24  ;;  %v930_v46 = vmul.f32 %v3421_v42, %v914_v34  ;;  %v854_v3 = vadd.f32 1.4214138, %v838_v10  ;;  %v900_v43 = vmul.f32 %v3433_v15, %v884_v11 }
 0x23d   : > { %v1023_v1 = vsub.f32 1.0, %v1007_v49  ;;  %v1009_v63 = vmul.f32 %v2492_v0, %v929_v16  ;;  %v869_v2 = vmul.f32 %v3439_v54, %v853_v51  ;;  %v915_v5 = vadd.f32 0.2548296, %v899_v12 }
 0x23e   : > { %v1024_v44 = vsub.f32 1.0, %v1008_v39  ;;  %v1010_v30 = vmul.f32 %v2494_v52, %v930_v46  ;;  %v870_v24 = vmul.f32 %v3443_v61, %v854_v3  ;;  %v916_v41 = vadd.f32 0.2548296, %v900_v43 }
 0x23f   : > { %v1055_v56 = vsub.f32 0.0, %v1023_v1  ;;  %v1025_v42 = vsub.f32 1.0, %v1009_v63  ;;  %v885_v21 = vadd.f32 -0.28449672, %v869_v2  ;;  %v931_v52 = vmul.f32 %v3429_v28, %v915_v5 }
 0x240   : > { %v1056_v18 = vsub.f32 0.0, %v1024_v44  ;;  %v1026_v27 = vsub.f32 1.0, %v1010_v30  ;;  %v886_v34 = vadd.f32 -0.28449672, %v870_v24  ;;  %v932_v50 = vmul.f32 %v3433_v15, %v916_v41 }
 0x241   : > { %v1071_v19 = vsel %vm1039_vm3, %v1055_v56, %v1023_v1  ;;  %v1057_v39 = vsub.f32 0.0, %v1025_v42  ;;  %v901_v10 = vmul.f32 %v3439_v54, %v885_v21  ;;  %v1011_v16 = vmul.f32 %v2496_v37, %v931_v52 }
 0x242   : > { %v1087_v49 = vadd.f32 1.0, %v1071_v19  ;;  %v1072_v0 = vsel %vm1040_vm4, %v1056_v18, %v1024_v44  ;;  %v1058_v48 = vsub.f32 0.0, %v1026_v27  ;;  %v902_v57 = vmul.f32 %v3443_v61, %v886_v34 }
 0x243   : > { %v1088_v40 = vadd.f32 1.0, %v1072_v0  ;;  %v1073_v58 = vsel %vm1041_vm5, %v1057_v39, %v1025_v42  ;;  %v1012_v28 = vmul.f32 %v2498_v4, %v932_v50  ;;  %v917_v46 = vadd.f32 0.2548296, %v901_v10 }
 0x244   : > { %v3475_v1 = vmul.f32 %v1087_v49, %v3385_v13  ;;  %v1074_v51 = vsel %vm1042_vm6, %v1058_v48, %v1026_v27  ;;  %v1089_v44 = vadd.f32 1.0, %v1073_v58  ;;  %v1027_v15 = vsub.f32 1.0, %v1011_v16  ;;  %v2178_v16 = vld [vmem:[%s3573_s8] ss:$0 sm:$0xff] }
 0x245   : > { %v3481_v23 = vmul.f32 %v1088_v40, %v3394_v60  ;;  %v1090_v11 = vadd.f32 1.0, %v1074_v51  ;;  %v918_v3 = vadd.f32 0.2548296, %v902_v57  ;;  %v1028_v13 = vsub.f32 1.0, %v1012_v28 }
 0x246   : > { %v3484_v56 = vmul.f32 %v1089_v44, %v3397_v45  ;;  %v933_v25 = vmul.f32 %v3439_v54, %v917_v46  ;;  %v1059_v63 = vsub.f32 0.0, %v1027_v15  ;;  %v708_v42 = vmul.f32 0.5, %v3377_v35  ;;  %v2177_v35 = vld [vmem:[%s3572_s7] ss:$0 sm:$0xff] }
 0x247   : > { %v3488_v37 = vmul.f32 %v1090_v11, %v3402_v62  ;;  %v934_v12 = vmul.f32 %v3443_v61, %v918_v3  ;;  %v1060_v4 = vsub.f32 0.0, %v1028_v13  ;;  %v709_v5 = vmul.f32 0.5, %v3383_v38 }
 0x248   : > { %v1013_v60 = vmul.f32 %v2500_v8, %v933_v25  ;;  %v2375_v2 = vpack.c.bf16 %v3484_v56, %v3475_v1  ;;  %v1075_v18 = vsel %vm1043_vm8, %v1059_v63, %v1027_v15  ;;  %v710_v27 = vmul.f32 0.5, %v3391_v53 }
 0x249   : > { %v1014_v45 = vmul.f32 %v2502_v33, %v934_v12  ;;  %v2373_v54 = vpack.c.bf16 %v3488_v37, %v3481_v23  ;;  %v1076_v30 = vsel %vm1044_vm9, %v1060_v4, %v1028_v13  ;;  %v1091_v43 = vadd.f32 1.0, %v1075_v18 }
 0x24a   : > { %v1029_v62 = vsub.f32 1.0, %v1013_v60  ;;  %v1092_v19 = vadd.f32 1.0, %v1076_v30  ;;  %v1634_v48 = vmul.f32 %v2177_v35, %v3351_v29  ;;  %v1635_v10 = vmul.f32 %v2177_v35, %v3349_v17  ;;  %v506_v60 = vld [vmem:[%s3574_s9 + $0x8] sm:$0xff] }
 0x24b   : > { %v1030_v24 = vsub.f32 1.0, %v1014_v45  ;;  %v1107_v33 = vmul.f32 %v1091_v43, %v707_v9  ;;  %v1636_v11 = vmul.f32 %v2177_v35, %v3355_v55  ;;  %v1637_v13 = vmul.f32 %v2177_v35, %v3353_v31  ;;  %v507_v55 = vld [vmem:[%s3574_s9 + $0x10] sm:$0xff]  ;;  %v508_v31 = vld [vmem:[%s3574_s9 + $0x18] sm:$0xff]  ;;  %v1848_v43 = vpop.permute.xlu1 %1847 }
 0x24c   : > { %v1061_v61 = vsub.f32 0.0, %v1029_v62  ;;  %v1108_v0 = vmul.f32 %v1092_v19, %v708_v42  ;;  %v3586_v18 = vmov 0.0  }
 0x24d   : > { %v1062_v8 = vsub.f32 0.0, %v1030_v24 }
 0x24e   : > { %v1077_v22 = vsel %vm1045_vm10, %v1061_v61, %v1029_v62 }
 0x24f   : > { %v1078_v21 = vsel %vm1046_vm11, %v1062_v8, %v1030_v24  ;;  %v1093_v49 = vadd.f32 1.0, %v1077_v22  ;;  %v1843_v42 = vpop.permute.xlu1 %1842 }
 0x250   : > { %v1094_v41 = vadd.f32 1.0, %v1078_v21 }
 0x251   : > { %v1109_v40 = vmul.f32 %v1093_v49, %v709_v5 }
 0x252   : > { %v1110_v39 = vmul.f32 %v1094_v41, %v710_v27 }
 0x253   : > { %v2379_v59 = vpack.c.bf16 %v1109_v40, %v1107_v33 }
 0x254   : > { %v2377_v52 = vpack.c.bf16 %v1110_v39, %v1108_v0 }
 0x28d   : > { %v2241_v36 = vpop.f32.mrb[16].mxu0 }
 0x28e   : > { %v2242_v7 = vpop.f32.mrb[17].mxu0 }
 0x28f   : > { %v2243_v34 = vadd.f32 %v2242_v7, %v2241_v36 }
 0x291   : > { %v2244_v38 = vpop.f32.mrb[18].mxu0  ;;  %v1705_v58 = vadd.f32 %v2243_v34, %v1634_v48 }
 0x292   : > { %v2245_v50 = vpop.f32.mrb[19].mxu0 }
 0x293   : > { %v2246_v53 = vadd.f32 %v2245_v50, %v2244_v38  ;;  %v1729_v28 = vadd.f32 %v2178_v16, %v1705_v58 }
 0x295   : > { %v1710_v57 = vadd.f32 %v2246_v53, %v1635_v10  ;;  %v2247_v51 = vpop.f32.mrb[20].mxu0 }
 0x296   : > { %v2248_v44 = vpop.f32.mrb[21].mxu0 }
 0x297   : > { %v1730_v46 = vadd.f32 %v2178_v16, %v1710_v57  ;;  %v2249_v23 = vadd.f32 %v2248_v44, %v2247_v51 }
 0x299   : > { %v2250_v15 = vpop.f32.mrb[22].mxu0  ;;  %v2365_v29 = vpack.c.bf16 %v1730_v46, %v1729_v28  ;;  %v1715_v17 = vadd.f32 %v2249_v23, %v1636_v11 }
 0x29a   : > { %v2251_v3 = vpop.f32.mrb[23].mxu0 }
 0x29b   : > { %v2252_v25 = vadd.f32 %v2251_v3, %v2250_v15  ;;  %2366 = vmatprep.subr.bf16.mxu1 %v2365_v29  ;;  %v1731_v63 = vadd.f32 %v2178_v16, %v1715_v17 }
 0x29c   : > { %2368 = vmatpush3.bf16.msra.mxu1 %v2365_v29 }
 0x29d   : > { %v1720_v37 = vadd.f32 %v2252_v25, %v1637_v13 }
 0x29f   : > { %v1732_v12 = vadd.f32 %v2178_v16, %v1720_v37 }
 0x2a1   : > { %v2369_v4 = vpack.c.bf16 %v1732_v12, %v1731_v63 }
 0x2a3   : > { %2370 = vmatprep.subr.bf16.mxu1 %v2369_v4 }
 0x2a4   : > { %2372 = vmatpush3.bf16.msra.mxu1 %v2369_v4 }
 0x2a5   : > { %2374 = vmatprep.subr.bf16.mxu1 %v2373_v54 }
 0x2a7   : > { %2298 = vmatmul.mubr.msk.f32.vlgmr.msra.gmra.mrb[8].mxu1 %vm565_vm0, %v506_v60 }
 0x2a8   : > { %2376 = vmatpush1.bf16.msra.mxu1 %v2375_v2  ;;  %2300 = vmatprep.mubr.msk.f32.mxu1 %vm565_vm0, %v507_v55 }
 0x2a9   : > { %2378 = vmatprep.subr.bf16.mxu1 %v2377_v52 }
 0x2ab   : > { %2301 = vmatmul.mubr.msk.f32.gmra.mrb[10].mxu1 %vm565_vm0, %v508_v31 }
 0x2ac   : > { %2380 = vmatpush1.bf16.msra.mxu1 %v2379_v59  ;;  %1926 = vmatprep.mubr.f32.mxu1 %v3586_v18 }
 0x2ad   : > { %2382 = vmatprep.subr.bf16.mxu1 %v3224_v20 }
 0x37a   : > { %v2299_v45 = vpop.f32.mrb[8].mxu1 }
 0x37b   : > { %v1811_v54 = vpop.f32.mrb[9].mxu1 }
 0x37c   : > { %2183 = vmatmul.mubr.msk.f32.vlgmr.msra.gmra.mrb[12].mxu1 %vm565_vm0, %v1811_v54 }
 0x37d   : > { %2384 = vmatpush3.bf16.msra.mxu1 %v3224_v20  ;;  %1932 = vmatprep.mubr.f32.mxu1 %v3586_v18  ;;  %v1838_v20 = vpop.permute.xlu0 %1837 }
 0x37e   : > { %2386 = vmatprep.subr.bf16.mxu1 %v3228_v6  ;;  %v2302_v1 = vpop.f32.mrb[10].mxu1 }
 0x37f   : > { %v1821_v56 = vpop.f32.mrb[11].mxu1 }
 0x380   : > { %2184 = vmatmul.mubr.msk.f32.gmra.mrb[14].mxu1 %vm565_vm0, %v2299_v45 }
 0x381   : > { %2388 = vmatpush3.bf16.msra.mxu1 %v3228_v6  ;;  %1938 = vmatprep.mubr.f32.mxu1 %v3586_v18  ;;  %v1833_v2 = vpop.permute.xlu0 %1832 }
 0x384   : > { %2185 = vmatmul.mubr.msk.f32.gmra.mrb[16].mxu1 %vm565_vm0, %v1821_v56 }
 0x385   : > { %1944 = vmatprep.mubr.f32.mxu1 %v3586_v18 }
 0x388   : > { %2186 = vmatmul.mubr.msk.f32.gmra.mrb[18].mxu1 %vm565_vm0, %v2302_v1 }
 0x389   : > { %2311 = vmatprep.mubr.msk.f32.mxu1 %vm565_vm0, %v1811_v54 }
 0x38c   : > { %2312 = vmatmul.mubr.msk.f32.vlgmr.msra.gmra.mrb[20].mxu1 %vm565_vm0, %v2299_v45 }
 0x38d   : > { %2314 = vmatprep.mubr.msk.f32.mxu1 %vm565_vm0, %v1821_v56 }
 0x390   : > { %2315 = vmatmul.mubr.msk.f32.gmra.mrb[22].mxu1 %vm565_vm0, %v2302_v1 }
 0x44f   : > { %v1928_v6 = vpop.f32.mrb[12].mxu1 }
 0x450   : > { %v1929_v30 = vadd.f32 %v1928_v6, %v1833_v2  ;;  %v1930_v62 = vpop.f32.mrb[13].mxu1 }
 0x451   : > { %v1931_v24 = vadd.f32 %v1930_v62, %v1833_v2 }
 0x452   : > { %1951 = vst [vmem:[%s441_s17] sm:$0xff] %v1929_v30 }
 0x453   : > { %1952 = vst [vmem:[%s441_s17 + $0x8] sm:$0xff] %v1931_v24  ;;  %v1934_v19 = vpop.f32.mrb[14].mxu1 }
 0x454   : > { %v1935_v61 = vadd.f32 %v1934_v19, %v1838_v20  ;;  %v1936_v9 = vpop.f32.mrb[15].mxu1 }
 0x455   : > { %v1937_v8 = vadd.f32 %v1936_v9, %v1838_v20 }
 0x456   : > { %1953 = vst [vmem:[%s441_s17 + $0x10] sm:$0xff] %v1935_v61 }
 0x457   : > { %1954 = vst [vmem:[%s441_s17 + $0x18] sm:$0xff] %v1937_v8  ;;  %v1940_v22 = vpop.f32.mrb[16].mxu1 }
 0x458   : > { %v1941_v33 = vadd.f32 %v1940_v22, %v1843_v42  ;;  %v1942_v5 = vpop.f32.mrb[17].mxu1 }
 0x459   : > { %v1943_v21 = vadd.f32 %v1942_v5, %v1843_v42 }
 0x45a   : > { %1955 = vst [vmem:[%s441_s17 + $0x20] sm:$0xff] %v1941_v33 }
 0x45b   : > { %1956 = vst [vmem:[%s441_s17 + $0x28] sm:$0xff] %v1943_v21  ;;  %v1946_v49 = vpop.f32.mrb[18].mxu1 }
 0x45c   : > { %v1947_v0 = vadd.f32 %v1946_v49, %v1848_v43  ;;  %v1948_v27 = vpop.f32.mrb[19].mxu1 }
 0x45d   : > { %v1949_v41 = vadd.f32 %v1948_v27, %v1848_v43 }
 0x45e   : > { %1957 = vst [vmem:[%s441_s17 + $0x30] sm:$0xff] %v1947_v0 }
 0x45f   : > { %1958 = vst [vmem:[%s441_s17 + $0x38] sm:$0xff] %v1949_v41  ;;  %v2313_v40 = vpop.f32.mrb[20].mxu1 }
 0x460   : > { %v2031_v39 = vadd.f32 %v2313_v40, %v3329_v26  ;;  %v2025_v59 = vpop.f32.mrb[21].mxu1 }
 0x461   : > { %v2026_v52 = vadd.f32 %v2025_v59, %v3341_v14 }
 0x462   : > { %2045 = vst.msk [vmem:[%s446_s19 + $0x8] sm:$0xff] %vm1557_vm7, %v2031_v39 }
 0x463   : > { %2044 = vst.msk [vmem:[%s446_s19] sm:$0xff] %vm1557_vm7, %v2026_v52  ;;  %v2316_v36 = vpop.f32.mrb[22].mxu1 }
 0x464   : > { %v2041_v35 = vadd.f32 %v2316_v36, %v3324_v32  ;;  %v2035_v7 = vpop.f32.mrb[23].mxu1 }
 0x465   : > { %v2036_v34 = vadd.f32 %v2035_v7, %v3336_v47 }
 0x466   : > { %2047 = vst.msk [vmem:[%s446_s19 + $0x18] sm:$0xff] %vm1557_vm7, %v2041_v35 }
 0x467   : > { %2046 = vst.msk [vmem:[%s446_s19 + $0x10] sm:$0xff] %vm1557_vm7, %v2036_v34 }
 0x468 PF: > { %s23_s21 = sadd.s32 1, %s2521_s21  }
 0x469   : > { %p20_p4 = scmp.ge.s32.totalorder %s23_s21, 4  }
 0x46b   :  { %22 = sbr.rel (!%p20_p4) target bundleno = 1 (0x1), region = 109 }

</bundles_post_ra>
